<compile_context>
chip_gen: v6e
topology: v6e:2x2x1
jax: 0.10.0
libtpu: 0.0.40
codegen_flags: <defaults>
</compile_context>

<pallas_src>
import functools

import jax
import jax.numpy as jnp
from jax.experimental import pallas as pl
from jax.experimental.pallas import tpu as pltpu


def _fairgnn_kernel(a_ref, rhs_ref, xwr_ref, invdeg_ref, dinv_ref, selfg_ref,
                    wc_ref, bc_ref, out_ref, acc_ref, *, h_pad, nclass):
    k = pl.program_id(1)

    @pl.when(k == 0)
    def _():
        acc_ref[...] = jnp.zeros_like(acc_ref)

    # int8 -> bf16 upcast of the streamed adjacency tile (only O(N^2) operand).
    # Two-step cast keeps the convert on well-supported i8->f32->bf16 paths.
    a = a_ref[...].astype(jnp.float32).astype(jnp.bfloat16)        # [TM, TK]
    # Single fused 256-wide MXU contraction covering both SAGE and GCN branches.
    acc_ref[...] += jnp.dot(a, rhs_ref[...],
                            preferred_element_type=jnp.float32)    # [TM, h_pad+128]

    @pl.when(k == pl.num_programs(1) - 1)
    def _():
        acc = acc_ref[...]

        # ---- SAGE branch: z = L2norm(mean_agg @ W_l + b_l + x @ W_r) ----
        z = acc[:, :h_pad] * invdeg_ref[...] + xwr_ref[...]
        sumsq = jnp.sum(z * z, axis=-1, keepdims=True)
        zn = z * jax.lax.rsqrt(jnp.maximum(sumsq, 1e-24))          # == 1/max(||z||,1e-12)

        # ---- classifier fused in-kernel: y = z @ W_c + b_c ----
        y = (jnp.dot(zn, wc_ref[...], preferred_element_type=jnp.float32)
             + bc_ref[...])                                        # [TM, c_pad]

        # ---- GCN estimator: s = dinv*(A @ (dinv*xW_g)) + dinv^2*xW_g + b_g ----
        s_col = acc[:, h_pad:h_pad + 1] * dinv_ref[...] + selfg_ref[...]   # [TM, 1]

        # merge s into spare lane `nclass` of the y slab (one lane-dense writeback)
        lane = jax.lax.broadcasted_iota(jnp.int32, y.shape, 1)
        out_ref[...] = jnp.where(lane == nclass, s_col, y).astype(out_ref.dtype)


def _round_up(v, m):
    return -(-v // m) * m


def _vmem_budget_bytes():
    cap = None
    try:
        info = pltpu.get_tpu_info()
        cap = getattr(info, "vmem_capacity_bytes", None)
    except Exception:
        cap = None
    if not cap:
        cap = 64 << 20                      # conservative (v7x-sized physical VMEM)
    # leave headroom for the compiler; cap well below v5e/v6e physical 128 MiB
    return int(min(cap * 3 // 4, 100 << 20))


def _bytes_needed(tm, tk, h_pad, c_pad, fused_w):
    a_bytes = 2 * tm * tk * 1                      # int8 A, double buffered
    rhs_bytes = 2 * tk * fused_w * 2               # bf16 fused RHS, double buffered
    xwr_bytes = 2 * tm * h_pad * 4                 # f32 X@W_r + b_l row tile
    rowscal_bytes = 3 * 2 * tm * 128 * 4           # (tm,1) f32 blocks lane-pad to 128
    wc_bytes = 2 * (h_pad * c_pad * 4 + 128 * c_pad * 4)
    acc_bytes = tm * fused_w * 4                   # f32 accumulator scratch
    out_bytes = 2 * tm * c_pad * 4                 # f32 output slab
    return (a_bytes + rhs_bytes + xwr_bytes + rowscal_bytes + wc_bytes
            + acc_bytes + out_bytes + (2 << 20))


def _choose_tiling(n, h_pad, c_pad, fused_w, vmem_budget):
    """Pick TM first (VMEM budget), then pad N to a multiple of max(TM, TK)."""
    lane = 128
    n128 = _round_up(max(n, 1), lane)
    for tm in (1024, 512, 256, 128):
        if tm > n128:                      # don't blow up tiny graphs with padding
            continue
        n_pad = _round_up(n128, tm)
        for tk in (n_pad, 8192, 4096, 2048, 1024, 512, 256, 128):
            if tk > n_pad or n_pad % tk != 0 or tk % lane != 0:
                continue
            if _bytes_needed(tm, tk, h_pad, c_pad, fused_w) <= vmem_budget:
                return tm, tk, n_pad
    return 128, 128, n128


def fairgnn_forward(edge_index, x, w_l, b_l, w_r, w_g, b_g, w_c, b_c):
    """edge_index: int32 [2, E]; x: f32 [N, F]. Returns (y [N, C], s [N, 1])."""
    n, f = x.shape
    h = w_l.shape[1]                # nhid
    c = w_c.shape[1]                # nclass

    LANE = 128
    h_pad = _round_up(h, LANE)
    c_pad = _round_up(c + 1, LANE)  # +1 guarantees a spare lane for the merged s column
    fused_w = h_pad + LANE          # fused RHS = [ X@W_l | dinv*(X@W_g) (col 0) ]

    budget = _vmem_budget_bytes()
    tm, tk, n_pad = _choose_tiling(n, h_pad, c_pad, fused_w, budget)

    # ---------- O(E) + O(N*F*H) glue (XLA): densify edges, precompute X @ W ----------
    src, tgt = edge_index[0], edge_index[1]
    adj = jnp.zeros((n_pad, n_pad), jnp.float32).at[tgt, src].add(1.0)   # raw adjacency
    deg_in = jnp.sum(adj, axis=1, keepdims=True)                         # in-degree (dups)
    inv_deg = 1.0 / jnp.maximum(deg_in, 1.0)                             # SAGE scatter-mean
    dinv = jax.lax.rsqrt(deg_in + 1.0)                                   # GCN sym-norm

    # int8 adjacency stream: exact as long as edge multiplicity <= 127
    max_mult = None
    try:
        max_mult = float(jnp.max(adj))
    except Exception:
        max_mult = None
    if max_mult is not None:
        assert max_mult <= 127.0, "edge multiplicity exceeds int8 range"
    a_i8 = adj.astype(jnp.int8)

    x_pad = jnp.zeros((n_pad, f), jnp.float32).at[:n, :].set(x)
    w_l_p = jnp.zeros((f, h_pad), jnp.float32).at[:, :h].set(w_l)
    w_r_p = jnp.zeros((f, h_pad), jnp.float32).at[:, :h].set(w_r)
    b_l_p = jnp.zeros((1, h_pad), jnp.float32).at[0, :h].set(b_l)
    w_c_p = jnp.zeros((h_pad, c_pad), jnp.float32).at[:h, :c].set(w_c)
    b_c_p = jnp.zeros((1, c_pad), jnp.float32).at[0, :c].set(b_c)

    # reassociated precompute: per-tile kernel work collapses to A_tile @ fused_RHS
    xwl = x_pad @ w_l_p                                   # [Np, H]   f32
    xwr_b = x_pad @ w_r_p + b_l_p                         # [Np, H]   f32 (bias exact)
    xwg = x_pad @ w_g                                     # [Np, 1]   f32
    xwg_s = dinv * xwg                                    # column-scaled GCN operand

    rhs = jnp.zeros((n_pad, fused_w), jnp.float32)
    rhs = rhs.at[:, :h_pad].set(xwl).at[:, h_pad:h_pad + 1].set(xwg_s)
    rhs = rhs.astype(jnp.bfloat16)                        # fused bf16 MXU RHS

    # GCN self-loop + bias folded into one f32 column: dinv^2*(x@w_g) + b_g
    self_term = dinv * xwg_s + b_g[0]                     # [Np, 1]

    grid = (n_pad // tm, n_pad // tk)
    kernel = functools.partial(_fairgnn_kernel, h_pad=h_pad, nclass=c)

    out = pl.pallas_call(
        kernel,
        out_shape=jax.ShapeDtypeStruct((n_pad, c_pad), jnp.float32),
        grid=grid,
        in_specs=[
            pl.BlockSpec((tm, tk), lambda i, k: (i, k)),          # A (int8 stream)
            pl.BlockSpec((tk, fused_w), lambda i, k: (k, 0)),     # fused X@W (bf16)
            pl.BlockSpec((tm, h_pad), lambda i, k: (i, 0)),       # X@W_r + b_l (f32)
            pl.BlockSpec((tm, 1), lambda i, k: (i, 0)),           # 1/deg (SAGE mean)
            pl.BlockSpec((tm, 1), lambda i, k: (i, 0)),           # dinv  (GCN row scale)
            pl.BlockSpec((tm, 1), lambda i, k: (i, 0)),           # self-loop + b_g
            pl.BlockSpec((h_pad, c_pad), lambda i, k: (0, 0)),    # W_c (resident)
            pl.BlockSpec((1, c_pad), lambda i, k: (0, 0)),        # b_c
        ],
        out_specs=pl.BlockSpec((tm, c_pad), lambda i, k: (i, 0)),
        scratch_shapes=[pltpu.VMEM((tm, fused_w), jnp.float32)],  # f32 accumulator
        compiler_params=pltpu.CompilerParams(
            dimension_semantics=("parallel", "arbitrary"),
            vmem_limit_bytes=budget,
        ),
    )(a_i8, rhs, xwr_b, inv_deg, dinv, self_term, w_c_p, b_c_p)

    return out[:n, :c], out[:n, c:c + 1]


if __name__ == "__main__":
    key = jax.random.PRNGKey(0)
    ks = jax.random.split(key, 9)

    # small shapes consistent with FairGNN: nhid=128, nclass=5, estimator out=1
    N, E = 300, 1200
    NFEAT, NHID, NCLASS = 32, 128, 5

    x = jax.random.normal(ks[0], (N, NFEAT), dtype=jnp.float32)
    edge_index = jax.random.randint(ks[1], (2, E), 0, N, dtype=jnp.int32)

    def _uniform(k, shape, fan_in):
        bound = 1.0 / float(fan_in) ** 0.5
        return jax.random.uniform(k, shape, jnp.float32, -bound, bound)

    # parameters stored pre-transposed to [in, out] so the kernel does X @ W
    w_l = _uniform(ks[2], (NFEAT, NHID), NFEAT)   # SAGEConv lin_l (has bias)
    b_l = _uniform(ks[3], (NHID,), NFEAT)
    w_r = _uniform(ks[4], (NFEAT, NHID), NFEAT)   # SAGEConv lin_r (no bias)
    w_g = _uniform(ks[5], (NFEAT, 1), NFEAT)      # estimator GCNConv(nfeat, 1)
    b_g = _uniform(ks[6], (1,), NFEAT)
    w_c = _uniform(ks[7], (NHID, NCLASS), NHID)   # classifier Linear(nhid, 5)
    b_c = _uniform(ks[8], (NCLASS,), NHID)

    y, s = fairgnn_forward(edge_index, x, w_l, b_l, w_r, w_g, b_g, w_c, b_c)
    y, s = jax.block_until_ready((y, s))

    # ----- pure-JAX f32 reference (PyG semantics) -----
    adj = jnp.zeros((N, N), jnp.float32).at[edge_index[1], edge_index[0]].add(1.0)
    deg = adj.sum(1, keepdims=True)
    agg = (adj @ x) / jnp.maximum(deg, 1.0)
    z = agg @ w_l + b_l + x @ w_r
    z = z / jnp.maximum(jnp.linalg.norm(z, axis=-1, keepdims=True), 1e-12)
    y_ref = z @ w_c + b_c

    dinv = 1.0 / jnp.sqrt(deg[:, 0] + 1.0)
    a_hat = dinv[:, None] * (adj + jnp.eye(N, dtype=jnp.float32)) * dinv[None, :]
    s_ref = a_hat @ (x @ w_g) + b_g

    assert y.shape == (N, NCLASS) and s.shape == (N, 1)
    # bf16 fused RHS streaming -> loosened tolerance (f32 accumulation keeps it tight)
    err_y = float(jnp.max(jnp.abs(y - y_ref)))
    err_s = float(jnp.max(jnp.abs(s - s_ref)))
    assert jnp.allclose(y, y_ref, atol=3e-2, rtol=3e-2), f"y mismatch, max abs err {err_y}"
    assert jnp.allclose(s, s_ref, atol=3e-2, rtol=3e-2), f"s mismatch, max abs err {err_s}"

    print("KERNEL_OK")
</pallas_src>

<mosaic_0001>
module attributes {stable_mosaic.version = 11 : i64} {
  func.func @_fairgnn_kernel(%arg0: i32, %arg1: i32, %arg2: memref<256x512xi8, #tpu.memory_space<vmem>>, %arg3: memref<512x256xbf16, #tpu.memory_space<vmem>>, %arg4: memref<256x128xf32, #tpu.memory_space<vmem>>, %arg5: memref<256x1xf32, #tpu.memory_space<vmem>>, %arg6: memref<256x1xf32, #tpu.memory_space<vmem>>, %arg7: memref<256x1xf32, #tpu.memory_space<vmem>>, %arg8: memref<128x128xf32, #tpu.memory_space<vmem>>, %arg9: memref<1x128xf32, #tpu.memory_space<vmem>>, %arg10: memref<256x128xf32, #tpu.memory_space<vmem>>, %arg11: memref<256x256xf32, #tpu.memory_space<vmem>>) attributes {dimension_semantics = [#tpu.dimension_semantics<parallel>, #tpu.dimension_semantics<arbitrary>], iteration_bounds = array<i64: 2, 1>, scalar_prefetch = 0 : i64, scratch_operands = 1 : i64, tpu.core_type = #tpu.core_type<tc>, window_params = [{transform_indices = @transform_0, window_bounds = array<i64: 256, 512>}, {transform_indices = @transform_1, window_bounds = array<i64: 512, 256>}, {transform_indices = @transform_2, window_bounds = array<i64: 256, 128>}, {transform_indices = @transform_3, window_bounds = array<i64: 256, 1>}, {transform_indices = @transform_4, window_bounds = array<i64: 256, 1>}, {transform_indices = @transform_5, window_bounds = array<i64: 256, 1>}, {pipeline_mode = #tpu.pipeline_mode<synchronous>, transform_indices = @transform_6, window_bounds = array<i64: 128, 128>}, {pipeline_mode = #tpu.pipeline_mode<synchronous>, transform_indices = @transform_7, window_bounds = array<i64: 1, 128>}, {transform_indices = @transform_8, window_bounds = array<i64: 256, 128>}]} {
    %c0_i32 = arith.constant 0 : i32
    %0 = arith.cmpi eq, %arg1, %c0_i32 : i32
    %1 = arith.extui %0 : i1 to i32
    %c0_i32_0 = arith.constant 0 : i32
    %2 = arith.cmpi ne, %1, %c0_i32_0 : i32
    scf.if %2 {
      %cst_10 = arith.constant 0.000000e+00 : f32
      %14 = vector.broadcast %cst_10 : f32 to vector<256x256xf32>
      %c0_11 = arith.constant 0 : index
      %c0_12 = arith.constant 0 : index
      %15 = vector.load %arg11[%c0_11, %c0_12] : memref<256x256xf32, #tpu.memory_space<vmem>>, vector<256x256xf32>
      tpu.vector_store %arg11[%c0_11, %c0_12], %14 {strides = array<i32>} : memref<256x256xf32, #tpu.memory_space<vmem>>, vector<256x256xf32>,
    } else {
    }
    %c0 = arith.constant 0 : index
    %c0_1 = arith.constant 0 : index
    %3 = vector.load %arg2[%c0, %c0_1] : memref<256x512xi8, #tpu.memory_space<vmem>>, vector<256x512xi8>
    %4 = arith.sitofp %3 : vector<256x512xi8> to vector<256x512xf32>
    %5 = arith.truncf %4 : vector<256x512xf32> to vector<256x512xbf16>
    %c0_2 = arith.constant 0 : index
    %c0_3 = arith.constant 0 : index
    %6 = vector.load %arg11[%c0_2, %c0_3] : memref<256x256xf32, #tpu.memory_space<vmem>>, vector<256x256xf32>
    %c0_4 = arith.constant 0 : index
    %c0_5 = arith.constant 0 : index
    %7 = vector.load %arg3[%c0_4, %c0_5] : memref<512x256xbf16, #tpu.memory_space<vmem>>, vector<512x256xbf16>
    %cst = arith.constant dense<0.000000e+00> : vector<256x256xf32>
    %8 = tpu.matmul %5, %7, %cst {dimension_numbers = #tpu.dot_dimension_numbers<[1], [0], [0], [1], [0, 0, 1, 1], [], []>} : vector<256x512xbf16>, vector<512x256xbf16>, vector<256x256xf32> -> vector<256x256xf32>
    %9 = arith.addf %6, %8 : vector<256x256xf32>
    %c0_6 = arith.constant 0 : index
    %c0_7 = arith.constant 0 : index
    %10 = vector.load %arg11[%c0_6, %c0_7] : memref<256x256xf32, #tpu.memory_space<vmem>>, vector<256x256xf32>
    tpu.vector_store %arg11[%c0_6, %c0_7], %9 {strides = array<i32>} : memref<256x256xf32, #tpu.memory_space<vmem>>, vector<256x256xf32>,
    %c0_i32_8 = arith.constant 0 : i32
    %11 = arith.cmpi eq, %arg1, %c0_i32_8 : i32
    %12 = arith.extui %11 : i1 to i32
    %c0_i32_9 = arith.constant 0 : i32
    %13 = arith.cmpi ne, %12, %c0_i32_9 : i32
    scf.if %13 {
      %c0_10 = arith.constant 0 : index
      %c0_11 = arith.constant 0 : index
      %14 = vector.load %arg11[%c0_10, %c0_11] : memref<256x256xf32, #tpu.memory_space<vmem>>, vector<256x256xf32>
      %15 = vector.extract_strided_slice %14 {offsets = [0, 0], sizes = [256, 128], strides = [1, 1]} : vector<256x256xf32> to vector<256x128xf32>
      %c0_12 = arith.constant 0 : index
      %c0_13 = arith.constant 0 : index
      %16 = vector.load %arg5[%c0_12, %c0_13] : memref<256x1xf32, #tpu.memory_space<vmem>>, vector<256x1xf32>
      %17 = vector.broadcast %16 : vector<256x1xf32> to vector<256x128xf32>
      %18 = arith.mulf %15, %17 : vector<256x128xf32>
      %c0_14 = arith.constant 0 : index
      %c0_15 = arith.constant 0 : index
      %19 = vector.load %arg4[%c0_14, %c0_15] : memref<256x128xf32, #tpu.memory_space<vmem>>, vector<256x128xf32>
      %20 = arith.addf %18, %19 : vector<256x128xf32>
      %21 = arith.mulf %20, %20 : vector<256x128xf32>
      %cst_16 = arith.constant dense<0.000000e+00> : vector<256xf32>
      %22 = vector.multi_reduction <add>, %21, %cst_16 [1] : vector<256x128xf32> to vector<256xf32>
      %23 = vector.shape_cast %22 : vector<256xf32> to vector<256x1xf32>
      %cst_17 = arith.constant 1.000000e-24 : f32
      %24 = vector.broadcast %cst_17 : f32 to vector<256x1xf32>
      %25 = arith.maximumf %23, %24 : vector<256x1xf32>
      %26 = math.rsqrt %25 : vector<256x1xf32>
      %27 = vector.broadcast %26 : vector<256x1xf32> to vector<256x128xf32>
      %28 = arith.mulf %20, %27 : vector<256x128xf32>
      %c0_18 = arith.constant 0 : index
      %c0_19 = arith.constant 0 : index
      %29 = vector.load %arg8[%c0_18, %c0_19] : memref<128x128xf32, #tpu.memory_space<vmem>>, vector<128x128xf32>
      %cst_20 = arith.constant dense<0.000000e+00> : vector<256x128xf32>
      %30 = tpu.matmul %28, %29, %cst_20 {dimension_numbers = #tpu.dot_dimension_numbers<[1], [0], [0], [1], [0, 0, 1, 1], [], []>} : vector<256x128xf32>, vector<128x128xf32>, vector<256x128xf32> -> vector<256x128xf32>
      %c0_21 = arith.constant 0 : index
      %c0_22 = arith.constant 0 : index
      %31 = vector.load %arg9[%c0_21, %c0_22] : memref<1x128xf32, #tpu.memory_space<vmem>>, vector<1x128xf32>
      %32 = vector.broadcast %31 : vector<1x128xf32> to vector<256x128xf32>
      %33 = arith.addf %30, %32 : vector<256x128xf32>
      %34 = vector.extract_strided_slice %14 {offsets = [0, 128], sizes = [256, 1], strides = [1, 1]} : vector<256x256xf32> to vector<256x1xf32>
      %c0_23 = arith.constant 0 : index
      %c0_24 = arith.constant 0 : index
      %35 = vector.load %arg6[%c0_23, %c0_24] : memref<256x1xf32, #tpu.memory_space<vmem>>, vector<256x1xf32>
      %36 = arith.mulf %34, %35 : vector<256x1xf32>
      %c0_25 = arith.constant 0 : index
      %c0_26 = arith.constant 0 : index
      %37 = vector.load %arg7[%c0_25, %c0_26] : memref<256x1xf32, #tpu.memory_space<vmem>>, vector<256x1xf32>
      %38 = arith.addf %36, %37 : vector<256x1xf32>
      %39 = tpu.iota {dimensions = array<i32: 1>} : vector<256x128xi32>
      %c5_i32 = arith.constant 5 : i32
      %40 = vector.broadcast %c5_i32 : i32 to vector<256x128xi32>
      %41 = arith.cmpi eq, %39, %40 : vector<256x128xi32>
      %42 = vector.shape_cast %38 : vector<256x1xf32> to vector<256x1xf32>
      %43 = vector.broadcast %42 : vector<256x1xf32> to vector<256x128xf32>
      %44 = arith.select %41, %43, %33 : vector<256x128xi1>, vector<256x128xf32>
      %c0_27 = arith.constant 0 : index
      %c0_28 = arith.constant 0 : index
      %45 = vector.load %arg10[%c0_27, %c0_28] : memref<256x128xf32, #tpu.memory_space<vmem>>, vector<256x128xf32>
      tpu.vector_store %arg10[%c0_27, %c0_28], %44 {strides = array<i32>} : memref<256x128xf32, #tpu.memory_space<vmem>>, vector<256x128xf32>,
    } else {
    }
    return
  }
  func.func @transform_0(%arg0: i32, %arg1: i32) -> (i32, i32) {
    %c0_i32 = arith.constant 0 : i32
    return %arg0, %arg1 : i32, i32
  }
  func.func @transform_1(%arg0: i32, %arg1: i32) -> (i32, i32) {
    %c0_i32 = arith.constant 0 : i32
    %c0_i32_0 = arith.constant 0 : i32
    return %arg1, %c0_i32 : i32, i32
  }
  func.func @transform_2(%arg0: i32, %arg1: i32) -> (i32, i32) {
    %c0_i32 = arith.constant 0 : i32
    %c0_i32_0 = arith.constant 0 : i32
    return %arg0, %c0_i32 : i32, i32
  }
  func.func @transform_3(%arg0: i32, %arg1: i32) -> (i32, i32) {
    %c0_i32 = arith.constant 0 : i32
    %c0_i32_0 = arith.constant 0 : i32
    return %arg0, %c0_i32 : i32, i32
  }
  func.func @transform_4(%arg0: i32, %arg1: i32) -> (i32, i32) {
    %c0_i32 = arith.constant 0 : i32
    %c0_i32_0 = arith.constant 0 : i32
    return %arg0, %c0_i32 : i32, i32
  }
  func.func @transform_5(%arg0: i32, %arg1: i32) -> (i32, i32) {
    %c0_i32 = arith.constant 0 : i32
    %c0_i32_0 = arith.constant 0 : i32
    return %arg0, %c0_i32 : i32, i32
  }
  func.func @transform_6(%arg0: i32, %arg1: i32) -> (i32, i32) {
    %c0_i32 = arith.constant 0 : i32
    %c0_i32_0 = arith.constant 0 : i32
    %c0_i32_1 = arith.constant 0 : i32
    return %c0_i32, %c0_i32_0 : i32, i32
  }
  func.func @transform_7(%arg0: i32, %arg1: i32) -> (i32, i32) {
    %c0_i32 = arith.constant 0 : i32
    %c0_i32_0 = arith.constant 0 : i32
    %c0_i32_1 = arith.constant 0 : i32
    return %c0_i32, %c0_i32_0 : i32, i32
  }
  func.func @transform_8(%arg0: i32, %arg1: i32) -> (i32, i32) {
    %c0_i32 = arith.constant 0 : i32
    %c0_i32_0 = arith.constant 0 : i32
    return %arg0, %c0_i32 : i32, i32
  }
}

</mosaic_0001>

<bundles_post_ra>
// kernel: tpu_custom_call.1
= control target key start
LH: loop header
LB: loop body
LE: loop exit
PB: predicated region body
PF: predicated region fallthrough
CT: control target
= control target key end

     0   :  { %s4558_s0 = inlined_call_operand.vmem [shape: s8[512,512], index: 0, kind: input, shape index: {}]   ;;  %s4559_s1 = inlined_call_operand.vmem [shape: bf16[512,256], index: 1, kind: input, shape index: {}]   ;;  %s4560_s2 = inlined_call_operand.vmem [shape: f32[512,128], index: 2, kind: input, shape index: {}]   ;;  %s4561_s3 = inlined_call_operand.vmem [shape: f32[512,1], index: 3, kind: input, shape index: {}]   ;;  %s4562_s4 = inlined_call_operand.vmem [shape: f32[512,1], index: 4, kind: input, shape index: {}]   ;;  %s4563_s5 = inlined_call_operand.vmem [shape: f32[512,1], index: 5, kind: input, shape index: {}]   ;;  %s4564_s6 = inlined_call_operand.hbm [shape: f32[128,128], index: 6, kind: input, shape index: {}]   ;;  %s4565_s7 = inlined_call_operand.vmem [shape: f32[1,128], index: 7, kind: input, shape index: {}]   ;;  %s4566_s8 = inlined_call_operand.hbm [shape: f32[512,128], index: 8, kind: output, shape index: {}]  }
   0x1   :  { %4583 = sst [smem:[#allocation25_spill]] %s4564_s6 }
   0x2   :  { %13 = vsyncpa [#allocation4], 0 }
   0x3   :  { %14 = vsyncpa [#allocation5], 0 }
   0x4   :  { %16 = vsyncpa [#allocation5 + $0x1], 0  ;;  %s3552_s27 = smov 0   ;;  %s3554_s28 = smov 0  }
   0x5   :  { %s3556_s29 = smov 0   ;;  %s3558_s30 = smov 0  }
   0x6   :  { %s3560_s9 = smov 0   ;;  %s3562_s10 = smov 0  }
   0x7 LB: > { %s2907_s11 = sadd.s32 4294967295, %s3498_s10   ;;  %s2908_s12 = sadd.s32 4294967294, %s3498_s10   ;;  %s3498_s10 = sphi %s3562_s10, %s22_s10   ;;  %s3494_s9 = sphi %s3560_s9, %s4625_s9   ;;  %s3490_s30 = sphi %s3558_s30, %s4624_s30   ;;  %s3486_s29 = sphi %s3556_s29, %s4623_s29   ;;  %s3482_s28 = sphi %s3554_s28, %s4622_s28   ;;  %s3478_s27 = sphi %s3552_s27, %s4621_s27  }
   0x8   : > { %s34_s13 = sadd.s32 1, %s3494_s9  ;;  %s241_s14 = sadd.s32 1, %s3486_s29 }
   0x9   : > { %p36_p0 = scmp.ge.s32.totalorder %s34_s13, 2  ;;  %p251_p1 = scmp.ne.s32.totalorder %s3486_s29, %s3482_s28 }
   0xa   : > { %p252_p2 = scmp.eq.s32.totalorder %s2907_s11, 1  ;;  %p257_p3 = scmp.ne.s32.totalorder %s3482_s28, %s3478_s27 }
   0xb   : > { %s4627_s13 = smov (%p36_p0, %s34_s13), 0  ;;  %p258_p5 = scmp.eq.s32.totalorder %s2908_s12, 1 }
   0xc   : > { %p3592_p4 = por %p252_p2, %p251_p1  ;;  %s238_s16 = ssub.s32 %s3494_s9, %s4627_s13 }
   0xd   : > { %p2909_p6 = scmp.ge.s32.totalorder %s3498_s10, 1  ;;  %p239_p7 = scmp.eq.s32.totalorder %s238_s16, 0 }
   0xe   : > { %p3599_p8 = por %p258_p5, %p257_p3  ;;  %p265_p9 = scmp.lt.s32.totalorder %s3498_s10, 3 }
   0xf   : > { %s3605_s18 = scalar_select %p239_p7, %s3486_s29, %s241_s14  }
  0x10   : > { %p3607_p10 = pnand %p2909_p6, %p265_p9  ;;  %p3611_p11 = scmp.eq.s32.totalorder %s2907_s11, 0 }
  0x11   : > { %s3500_s21 = smov [#allocation3]  }
  0x12   : > { %p3165_p12 = pneg %p3607_p10  ;;  %s287_s22 = sshll.u32 %s3500_s21, 4  ;;  %s288_s22 = int_to_ptr.vmem [resolvable:$true] %s287_s22 }
  0x13   : > { %s3403_s23 = scalar_lea.vmem %s288_s22, 2048  ;;  %p3411_p5 = scmp.lt.s32.totalorder %s288_s22, %s288_s22 }
  0x14   : > { %p3166_p13 = pnand %p3611_p11, %p3165_p12  ;;  %p3404_p1 = scmp.ne.s32.totalorder %s288_s22, %s3403_s23 }
  0x15   : > { %p3412_p6 = scmp.lt.s32.totalorder %s3403_s23, %s3403_s23 }
  0x16   : > { %p3394_p0 = pneg %p3166_p13 }
  0x17   : > { %p3413_p7 = por %p3412_p6, %p3411_p5 }
  0x18   : > { %p3406_p2 = pnand %p3404_p1, %p3394_p0 }
  0x1a   : > { %p3407_p3 = pneg %p3406_p2 }
  0x1c   : > { %p3414_p9 = pnand %p3413_p7, %p3407_p3 }
  0x1e   : > { %3417 = shalt.err (!%p3414_p9)
}
  0x1f   : > { %s3501_s24 = smov 128   ;;  %s3502_s25 = smov 8  }
  0x20   : > { %s4588_s6 = sld [smem:[#allocation25_spill]] }
  0x22   : > { %357 = sbr.rel (%p3607_p10) target bundleno = 800 (0x320), region = 52 }
  0x26   : > { %3168 = dma.hbm_to_vmem [thread:$0]  (!%p3166_p13), %s4588_s6, 2048, %s288_s22, [#allocation4], %s3501_s24, %s3501_s24, %s3502_s25  }
  0x27   : > { %3469 = dma.done.wait (%p3611_p11), [#allocation4], 2048  }
  0x28   : > { %3471 = vsyncadd (%p3611_p11), [#allocation4], 4294965248  ;;  %v3232_v0 = vld [vmem:[%s4559_s1 + $0x74] ss:$8 sps:$4 sm:$0xff]   ;;  %v3236_v2 = vld [vmem:[%s4559_s1 + $0x70] ss:$8 sps:$4 sm:$0xff]  }
  0x29   : > { %v3234_v1 = vld [vmem:[%s4559_s1 + $0x174] ss:$8 sps:$4 sm:$0xff]   ;;  %1078 = vmatprep.subr.bf16.mxu0 %v3232_v0  ;;  %v3237_v3 = vld [vmem:[%s4559_s1 + $0x170] ss:$8 sps:$4 sm:$0xff]   ;;  %v3238_v4 = vld [vmem:[%s4559_s1 + $0x64] ss:$8 sps:$4 sm:$0xff]  }
  0x2a   : > { %1271 = vmatprep.subr.bf16.mxu1 %v3234_v1  ;;  %1079 = vmatpush1.bf16.msra.mxu0 %v3236_v2  ;;  %v3240_v5 = vld [vmem:[%s4559_s1 + $0x164] ss:$8 sps:$4 sm:$0xff]   ;;  %v3242_v6 = vld [vmem:[%s4559_s1 + $0x60] ss:$8 sps:$4 sm:$0xff]   ;;  %v3503_v8 = vmov 0   ;;  %s2916_s26 = sshll.u32 %s3490_s30, 3 }
  0x2b   : > { %1272 = vmatpush1.bf16.msra.mxu1 %v3237_v3  ;;  %1080 = vmatprep.subr.bf16.mxu0 %v3238_v4  ;;  %v3243_v7 = vld [vmem:[%s4559_s1 + $0x160] ss:$8 sps:$4 sm:$0xff]   ;;  %v3244_v9 = vld [vmem:[%s4559_s1 + $0x54] ss:$8 sps:$4 sm:$0xff]   ;;  %v3248_v11 = vld [vmem:[%s4559_s1 + $0x50] ss:$8 sps:$4 sm:$0xff]  }
  0x2c   : > { %3230 = vset.pattern.permute.xlu0 %v3503_v8  ;;  %1273 = vmatprep.subr.bf16.mxu1 %v3240_v5  ;;  %v3246_v10 = vld [vmem:[%s4559_s1 + $0x154] ss:$8 sps:$4 sm:$0xff]   ;;  %v3249_v12 = vld [vmem:[%s4559_s1 + $0x150] ss:$8 sps:$4 sm:$0xff]   ;;  %v3250_v13 = vld [vmem:[%s4559_s1 + $0x44] ss:$8 sps:$4 sm:$0xff]  }
  0x2d   : > { %3231 = vset.pattern.permute.xlu1 %v3503_v8  ;;  %v3252_v14 = vld [vmem:[%s4559_s1 + $0x144] ss:$8 sps:$4 sm:$0xff]   ;;  %v3254_v15 = vld [vmem:[%s4559_s1 + $0x40] ss:$8 sps:$4 sm:$0xff]   ;;  %v3256_v17 = vld [vmem:[%s4559_s1 + $0x34] ss:$8 sps:$4 sm:$0xff]  }
  0x2e   : > { %1081 = vmatpush1.bf16.msra.mxu0 %v3242_v6  ;;  %v3255_v16 = vld [vmem:[%s4559_s1 + $0x140] ss:$8 sps:$4 sm:$0xff]   ;;  %v3258_v18 = vld [vmem:[%s4559_s1 + $0x134] ss:$8 sps:$4 sm:$0xff]   ;;  %v3260_v19 = vld [vmem:[%s4559_s1 + $0x30] ss:$8 sps:$4 sm:$0xff]  }
  0x2f   : > { %1274 = vmatpush1.bf16.msra.mxu1 %v3243_v7  ;;  %1082 = vmatprep.subr.bf16.mxu0 %v3244_v9  ;;  %v3261_v20 = vld [vmem:[%s4559_s1 + $0x130] ss:$8 sps:$4 sm:$0xff]   ;;  %v3262_v21 = vld [vmem:[%s4559_s1 + $0x24] ss:$8 sps:$4 sm:$0xff]   ;;  %v3266_v23 = vld [vmem:[%s4559_s1 + $0x20] ss:$8 sps:$4 sm:$0xff]  }
  0x30   : > { %1275 = vmatprep.subr.bf16.mxu1 %v3246_v10  ;;  %v3264_v22 = vld [vmem:[%s4559_s1 + $0x124] ss:$8 sps:$4 sm:$0xff]   ;;  %v3267_v24 = vld [vmem:[%s4559_s1 + $0x120] ss:$8 sps:$4 sm:$0xff]   ;;  %v3268_v25 = vld [vmem:[%s4559_s1 + $0x14] ss:$8 sps:$4 sm:$0xff]  }
  0x31   : > { %v3270_v26 = vld [vmem:[%s4559_s1 + $0x114] ss:$8 sps:$4 sm:$0xff]   ;;  %v3272_v27 = vld [vmem:[%s4559_s1 + $0x10] ss:$8 sps:$4 sm:$0xff]   ;;  %v3274_v29 = vld [vmem:[%s4559_s1 + $0x4] ss:$8 sps:$4 sm:$0xff]  }
  0x32   : > { %1083 = vmatpush1.bf16.msra.mxu0 %v3248_v11  ;;  %v3273_v28 = vld [vmem:[%s4559_s1 + $0x110] ss:$8 sps:$4 sm:$0xff]   ;;  %v3276_v30 = vld [vmem:[%s4559_s1 + $0x104] ss:$8 sps:$4 sm:$0xff]   ;;  %v3278_v31 = vld [vmem:[%s4559_s1] ss:$8 sps:$4 sm:$0xff]  }
  0x33   : > { %1276 = vmatpush1.bf16.msra.mxu1 %v3249_v12  ;;  %1084 = vmatprep.subr.bf16.mxu0 %v3250_v13  ;;  %p424_p10 = scmp.lt.s32.totalorder %s2916_s26, 15  ;;  %v3279_v32 = vld [vmem:[%s4559_s1 + $0x100] ss:$8 sps:$4 sm:$0xff]   ;;  %v3280_v33 = vld [vmem:[%s4559_s1 + $0xf4] ss:$8 sps:$4 sm:$0xff]   ;;  %s2919_s23 = sshll.u32 %s3490_s30, 5 }
  0x34   : > { %1277 = vmatprep.subr.bf16.mxu1 %v3252_v14  ;;  %v3282_v34 = vld [vmem:[%s4559_s1 + $0x1f4] ss:$8 sps:$4 sm:$0xff]   ;;  %v3284_v35 = vld [vmem:[%s4559_s1 + $0xf0] ss:$8 sps:$4 sm:$0xff]   ;;  %v3286_v37 = vld [vmem:[%s4559_s1 + $0xe4] ss:$8 sps:$4 sm:$0xff]  }
  0x35   : > { %v3285_v36 = vld [vmem:[%s4559_s1 + $0x1f0] ss:$8 sps:$4 sm:$0xff]   ;;  %s4629_s26 = smov (!%p424_p10, %s2916_s26), 15  ;;  %v3288_v38 = vld [vmem:[%s4559_s1 + $0x1e4] ss:$8 sps:$4 sm:$0xff]   ;;  %p442_p11 = scmp.lt.s32.totalorder %s2919_s23, 63 }
  0x36   : > { %1085 = vmatpush1.bf16.msra.mxu0 %v3254_v15  ;;  %v3290_v39 = vld [vmem:[%s4559_s1 + $0xe0] ss:$8 sps:$4 sm:$0xff]   ;;  %s2997_s25 = sshll.u32 %s4629_s26, 5  ;;  %v3292_v41 = vld [vmem:[%s4559_s1 + $0xd4] ss:$8 sps:$4 sm:$0xff]   ;;  %s2998_s16 = sshll.u32 %s3490_s30, 12 }
  0x37   : > { %1278 = vmatpush1.bf16.msra.mxu1 %v3255_v16  ;;  %1086 = vmatprep.subr.bf16.mxu0 %v3256_v17  ;;  %v3291_v40 = vld [vmem:[%s4559_s1 + $0x1e0] ss:$8 sps:$4 sm:$0xff]   ;;  %v3294_v42 = vld [vmem:[%s4559_s1 + $0x1d4] ss:$8 sps:$4 sm:$0xff]   ;;  %s3759_s26 = scalar_lea.vmem %s4558_s0, %s2997_s25  ;;  %v3296_v43 = vld [vmem:[%s4559_s1 + $0xd0] ss:$8 sps:$4 sm:$0xff]  }
  0x38   : > { %1279 = vmatprep.subr.bf16.mxu1 %v3258_v18  ;;  %v3297_v44 = vld [vmem:[%s4559_s1 + $0x1d0] ss:$8 sps:$4 sm:$0xff]   ;;  %s4631_s23 = smov (!%p442_p11, %s2919_s23), 63  ;;  %v3298_v45 = vld [vmem:[%s4559_s1 + $0xc4] ss:$8 sps:$4 sm:$0xff]   ;;  %s3504_s20 = smov [#allocation6]  }
  0x39   : > { %v3300_v46 = vld [vmem:[%s4559_s1 + $0x1c4] ss:$8 sps:$4 sm:$0xff]   ;;  %v3778_v49 = vld [vmem:[%s3759_s26 + $0x18] sm:$0xff]  ;;  %s3780_s6 = sshll.u32 %s4631_s23, 3  ;;  %v3302_v50 = vld [vmem:[%s4559_s1 + $0xc0] ss:$8 sps:$4 sm:$0xff]  }
  0x3a   : > { %1087 = vmatpush1.bf16.msra.mxu0 %v3260_v19  ;;  %v3774_v47 = vld [vmem:[%s3759_s26 + $0x8] sm:$0xff]  ;;  %v569_v52 = vunpack.c.l.s8.bf16 %v3778_v49  ;;  %v3304_v53 = vld [vmem:[%s4559_s1 + $0xb4] ss:$8 sps:$4 sm:$0xff]   ;;  %s3799_s21 = scalar_lea.vmem %s4561_s3, %s3780_s6  ;;  %v3308_v55 = vld [vmem:[%s4559_s1 + $0xb0] ss:$8 sps:$4 sm:$0xff]   ;;  %s4179_s19 = scalar_lea.vmem %s4562_s4, %s3780_s6 }
  0x3b   : > { %1280 = vmatpush1.bf16.msra.mxu1 %v3261_v20  ;;  %1088 = vmatprep.subr.bf16.mxu0 %v3262_v21  ;;  %v567_v48 = vunpack.c.l.s8.bf16 %v3774_v47  ;;  %v3303_v51 = vld [vmem:[%s4559_s1 + $0x1c0] ss:$8 sps:$4 sm:$0xff]   ;;  %v3306_v54 = vld [vmem:[%s4559_s1 + $0x1b4] ss:$8 sps:$4 sm:$0xff]   ;;  %v3309_v56 = vld [vmem:[%s4559_s1 + $0x1b0] ss:$8 sps:$4 sm:$0xff]   ;;  %v571_v19 = vunpack.c.h.s8.bf16 %v3774_v47  ;;  %v573_v20 = vunpack.c.h.s8.bf16 %v3778_v49  ;;  %s4196_s11 = scalar_lea.vmem %s4563_s5, %s3780_s6 }
  0x3c   : > { %1281 = vmatprep.subr.bf16.mxu1 %v3264_v22  ;;  %1303 = vmatprep.mubr.bf16.mxu1 %v569_v52  ;;  %v3310_v57 = vld [vmem:[%s4559_s1 + $0xa4] ss:$8 sps:$4 sm:$0xff]   ;;  %v3314_v63 = vld [vmem:[%s4559_s1 + $0xa0] ss:$8 sps:$4 sm:$0xff]   ;;  %v3316_v1 = vld [vmem:[%s4559_s1 + $0x94] ss:$8 sps:$4 sm:$0xff]  }
  0x3d   : > { %1110 = vmatprep.mubr.bf16.mxu0 %v567_v48  ;;  %v3312_v58 = vld [vmem:[%s4559_s1 + $0x1a4] ss:$8 sps:$4 sm:$0xff]   ;;  %v3315_v0 = vld [vmem:[%s4559_s1 + $0x1a0] ss:$8 sps:$4 sm:$0xff]   ;;  %v3318_v2 = vld [vmem:[%s4559_s1 + $0x194] ss:$8 sps:$4 sm:$0xff]  }
  0x3e   : > { %1089 = vmatpush1.bf16.msra.mxu0 %v3266_v23  ;;  %v1659_v59 = vld [vmem:[%s3799_s21] sm:$0xff]  ;;  %v1660_v60 = vld [vmem:[%s3799_s21 + $0x8] sm:$0xff]  ;;  %v1661_v3 = vld [vmem:[%s3799_s21 + $0x10] sm:$0xff] }
  0x3f   : > { %1282 = vmatpush1.bf16.msra.mxu1 %v3267_v24  ;;  %1090 = vmatprep.subr.bf16.mxu0 %v3268_v25  ;;  %v1675_v61 = vld [vmem:[%s3799_s21 + $0x80] sm:$0xff]  ;;  %v1676_v62 = vld [vmem:[%s3799_s21 + $0x88] sm:$0xff]  ;;  %v1677_v4 = vld [vmem:[%s3799_s21 + $0x90] sm:$0xff] }
  0x40   : > { %1283 = vmatprep.subr.bf16.mxu1 %v3270_v26  ;;  %1693 = vperm.xlu0 %3230, %v1659_v59   ;;  %v3320_v5 = vld [vmem:[%s4559_s1 + $0x90] ss:$8 sps:$4 sm:$0xff]   ;;  %v3322_v7 = vld [vmem:[%s4559_s1 + $0x84] ss:$8 sps:$4 sm:$0xff]   ;;  %v3326_v9 = vld [vmem:[%s4559_s1 + $0x80] ss:$8 sps:$4 sm:$0xff]  }
  0x41   : > { %1698 = vperm.xlu1 %3231, %v1660_v60   ;;  %v3321_v6 = vld [vmem:[%s4559_s1 + $0x190] ss:$8 sps:$4 sm:$0xff]   ;;  %v3324_v8 = vld [vmem:[%s4559_s1 + $0x184] ss:$8 sps:$4 sm:$0xff]   ;;  %v3327_v12 = vld [vmem:[%s4559_s1 + $0x180] ss:$8 sps:$4 sm:$0xff]  }
  0x42   : > { %1091 = vmatpush1.bf16.msra.mxu0 %v3272_v27  ;;  %v1662_v10 = vld [vmem:[%s3799_s21 + $0x18] sm:$0xff]  ;;  %v534_v13 = vld [vmem:[%s3759_s26] sm:$0xff]  ;;  %v536_v14 = vld [vmem:[%s3759_s26 + $0x10] sm:$0xff] }
  0x43   : > { %1284 = vmatpush1.bf16.msra.mxu1 %v3273_v28  ;;  %1092 = vmatprep.subr.bf16.mxu0 %v3274_v29  ;;  %v1678_v11 = vld [vmem:[%s3799_s21 + $0x98] sm:$0xff]  ;;  %v566_v15 = vunpack.c.l.s8.bf16 %v534_v13  ;;  %v568_v16 = vunpack.c.l.s8.bf16 %v536_v14  ;;  %v1663_v17 = vld [vmem:[%s3799_s21 + $0x20] sm:$0xff]  ;;  %v1664_v21 = vld [vmem:[%s3799_s21 + $0x28] sm:$0xff]  ;;  %v570_v25 = vunpack.c.h.s8.bf16 %v534_v13  ;;  %v572_v26 = vunpack.c.h.s8.bf16 %v536_v14 }
  0x44   : > { %1285 = vmatprep.subr.bf16.mxu1 %v3276_v30  ;;  %1773 = vperm.xlu0 %3230, %v1675_v61   ;;  %v1679_v18 = vld [vmem:[%s3799_s21 + $0xa0] sm:$0xff]  ;;  %v1680_v22 = vld [vmem:[%s3799_s21 + $0xa8] sm:$0xff]  ;;  %v541_v24 = vld [vmem:[%s3759_s26 + $0x38] sm:$0xff] }
  0x45   : > { %1778 = vperm.xlu1 %3231, %v1676_v62   ;;  %v539_v23 = vld [vmem:[%s3759_s26 + $0x28] sm:$0xff]  ;;  %v1665_v27 = vld [vmem:[%s3799_s21 + $0x30] sm:$0xff]  ;;  %v577_v30 = vunpack.c.l.s8.bf16 %v541_v24  ;;  %v1686_v52 = vld [vmem:[%s3799_s21 + $0xd8] sm:$0xff] }
  0x46   : > { %1093 = vmatpush1.bf16.msra.mxu0 %v3278_v31  ;;  %v1681_v28 = vld [vmem:[%s3799_s21 + $0xb0] sm:$0xff]  ;;  %v575_v29 = vunpack.c.l.s8.bf16 %v539_v23  ;;  %v1666_v31 = vld [vmem:[%s3799_s21 + $0x38] sm:$0xff]  ;;  %v1672_v61 = vld [vmem:[%s3799_s21 + $0x68] sm:$0xff] }
  0x47   : > { %1286 = vmatpush1.bf16.msra.mxu1 %v3279_v32  ;;  %1094 = vmatprep.subr.bf16.mxu0 %v3280_v33  ;;  %v1682_v32 = vld [vmem:[%s3799_s21 + $0xb8] sm:$0xff]  ;;  %v538_v33 = vld [vmem:[%s3759_s26 + $0x20] sm:$0xff]  ;;  %v1669_v47 = vld [vmem:[%s3799_s21 + $0x50] sm:$0xff] }
  0x48   : > { %1287 = vmatprep.subr.bf16.mxu1 %v3282_v34  ;;  %1703 = vperm.xlu0 %3230, %v1661_v3   ;;  %v540_v34 = vld [vmem:[%s3759_s26 + $0x30] sm:$0xff]  ;;  %v1688_v62 = vld [vmem:[%s3799_s21 + $0xe8] sm:$0xff] }
  0x49   : > { %1783 = vperm.xlu1 %3231, %v1677_v4   ;;  %v1685_v48 = vld [vmem:[%s3799_s21 + $0xd0] sm:$0xff] }
  0x4a   : > { %1095 = vmatpush2.bf16.msra.mxu0 %v3284_v35  ;;  %v574_v35 = vunpack.c.l.s8.bf16 %v538_v33  ;;  %v1673_v3 = vld [vmem:[%s3799_s21 + $0x70] sm:$0xff] }
  0x4b   : > { %1288 = vmatpush2.bf16.msra.mxu1 %v3285_v36  ;;  %1096 = vmatprep.subr.bf16.mxu0 %v3286_v37  ;;  %v576_v36 = vunpack.c.l.s8.bf16 %v540_v34  ;;  %v1667_v37 = vld [vmem:[%s3799_s21 + $0x40] sm:$0xff]  ;;  %v1689_v4 = vld [vmem:[%s3799_s21 + $0xf0] sm:$0xff] }
  0x4c   : > { %1289 = vmatprep.subr.bf16.mxu1 %v3288_v38  ;;  %1708 = vperm.xlu0 %3230, %v1662_v10   ;;  %v1683_v38 = vld [vmem:[%s3799_s21 + $0xc0] sm:$0xff]  ;;  %v548_v10 = vld [vmem:[%s3759_s26 + $0x70] sm:$0xff] }
  0x4d   : > { %1788 = vperm.xlu1 %3231, %v1678_v11  }
  0x4e   : > { %1097 = vmatpush2.bf16.msra.mxu0 %v3290_v39  ;;  %v579_v39 = vunpack.c.h.s8.bf16 %v539_v23 }
  0x4f   : > { %1290 = vmatpush2.bf16.msra.mxu1 %v3291_v40  ;;  %1098 = vmatprep.subr.bf16.mxu0 %v3292_v41  ;;  %v581_v40 = vunpack.c.h.s8.bf16 %v541_v24  ;;  %v1668_v41 = vld [vmem:[%s3799_s21 + $0x48] sm:$0xff] }
  0x50   : > { %1291 = vmatprep.subr.bf16.mxu1 %v3294_v42  ;;  %1713 = vperm.xlu0 %3230, %v1663_v17   ;;  %v1684_v42 = vld [vmem:[%s3799_s21 + $0xc8] sm:$0xff] }
  0x51   : > { %1793 = vperm.xlu1 %3231, %v1679_v18   ;;  %v596_v18 = vunpack.c.h.s8.bf16 %v548_v10 }
  0x52   : > { %1099 = vmatpush2.bf16.msra.mxu0 %v3296_v43  ;;  %v543_v43 = vld [vmem:[%s3759_s26 + $0x48] sm:$0xff] }
  0x53   : > { %1292 = vmatpush2.bf16.msra.mxu1 %v3297_v44  ;;  %1100 = vmatprep.subr.bf16.mxu0 %v3298_v45  ;;  %v545_v44 = vld [vmem:[%s3759_s26 + $0x58] sm:$0xff]  ;;  %v578_v45 = vunpack.c.h.s8.bf16 %v538_v33  ;;  %v583_v49 = vunpack.c.l.s8.bf16 %v543_v43  ;;  %v587_v59 = vunpack.c.h.s8.bf16 %v543_v43  ;;  %v554_v33 = vld [vmem:[%s3759_s26 + $0xa0] sm:$0xff] }
  0x54   : > { %1293 = vmatprep.subr.bf16.mxu1 %v3300_v46  ;;  %1718 = vperm.xlu0 %3230, %v1664_v21   ;;  %v580_v46 = vunpack.c.h.s8.bf16 %v540_v34  ;;  %v589_v60 = vunpack.c.h.s8.bf16 %v545_v44  ;;  %v550_v21 = vld [vmem:[%s3759_s26 + $0x80] sm:$0xff]  ;;  %v556_v34 = vld [vmem:[%s3759_s26 + $0xb0] sm:$0xff] }
  0x55   : > { %1798 = vperm.xlu1 %3231, %v1680_v22   ;;  %v552_v22 = vld [vmem:[%s3759_s26 + $0x90] sm:$0xff]  ;;  %v598_v23 = vunpack.c.l.s8.bf16 %v550_v21 }
  0x56   : > { %1101 = vmatpush2.bf16.msra.mxu0 %v3302_v50  ;;  %v585_v50 = vunpack.c.l.s8.bf16 %v545_v44  ;;  %v600_v24 = vunpack.c.l.s8.bf16 %v552_v22 }
  0x57   : > { %1294 = vmatpush2.bf16.msra.mxu1 %v3303_v51  ;;  %1102 = vmatprep.subr.bf16.mxu0 %v3304_v53  ;;  %v1670_v51 = vld [vmem:[%s3799_s21 + $0x58] sm:$0xff]  ;;  %v542_v53 = vld [vmem:[%s3759_s26 + $0x40] sm:$0xff] }
  0x58   : > { %1295 = vmatprep.subr.bf16.mxu1 %v3306_v54  ;;  %1723 = vperm.xlu0 %3230, %v1665_v27   ;;  %v544_v54 = vld [vmem:[%s3759_s26 + $0x50] sm:$0xff]  ;;  %v555_v27 = vld [vmem:[%s3759_s26 + $0xa8] sm:$0xff] }
  0x59   : > { %1803 = vperm.xlu1 %3231, %v1681_v28   ;;  %v557_v28 = vld [vmem:[%s3759_s26 + $0xb8] sm:$0xff] }
  0x5a   : > { %1103 = vmatpush2.bf16.msra.mxu0 %v3308_v55  ;;  %v582_v55 = vunpack.c.l.s8.bf16 %v542_v53 }
  0x5b   : > { %1296 = vmatpush2.bf16.msra.mxu1 %v3309_v56  ;;  %1104 = vmatprep.subr.bf16.mxu0 %v3310_v57  ;;  %v584_v56 = vunpack.c.l.s8.bf16 %v544_v54  ;;  %v1671_v57 = vld [vmem:[%s3799_s21 + $0x60] sm:$0xff] }
  0x5c   : > { %1297 = vmatprep.subr.bf16.mxu1 %v3312_v58  ;;  %1728 = vperm.xlu0 %3230, %v1666_v31   ;;  %v1687_v58 = vld [vmem:[%s3799_s21 + $0xe0] sm:$0xff]  ;;  %v607_v31 = vunpack.c.l.s8.bf16 %v555_v27 }
  0x5d   : > { %1808 = vperm.xlu1 %3231, %v1682_v32   ;;  %v609_v32 = vunpack.c.l.s8.bf16 %v557_v28 }
  0x5e   : > { %1105 = vmatpush2.bf16.msra.mxu0 %v3314_v63  ;;  %v547_v63 = vld [vmem:[%s3759_s26 + $0x68] sm:$0xff] }
  0x5f   : > { %1298 = vmatpush2.bf16.msra.mxu1 %v3315_v0  ;;  %1106 = vmatprep.subr.bf16.mxu0 %v3316_v1  ;;  %v549_v0 = vld [vmem:[%s3759_s26 + $0x78] sm:$0xff]  ;;  %v586_v1 = vunpack.c.h.s8.bf16 %v542_v53  ;;  %v595_v13 = vunpack.c.h.s8.bf16 %v547_v63 }
  0x60   : > { %1299 = vmatprep.subr.bf16.mxu1 %v3318_v2  ;;  %1733 = vperm.xlu0 %3230, %v1667_v37   ;;  %v588_v2 = vunpack.c.h.s8.bf16 %v544_v54  ;;  %v597_v14 = vunpack.c.h.s8.bf16 %v549_v0  ;;  %v611_v37 = vunpack.c.h.s8.bf16 %v555_v27 }
  0x61   : > { %1813 = vperm.xlu1 %3231, %v1683_v38   ;;  %v613_v38 = vunpack.c.h.s8.bf16 %v557_v28 }
  0x62   : > { %1107 = vmatpush2.bf16.msra.mxu0 %v3320_v5  ;;  %v591_v5 = vunpack.c.l.s8.bf16 %v547_v63 }
  0x63   : > { %1300 = vmatpush2.bf16.msra.mxu1 %v3321_v6  ;;  %1108 = vmatprep.subr.bf16.mxu0 %v3322_v7  ;;  %v593_v6 = vunpack.c.l.s8.bf16 %v549_v0  ;;  %v1674_v7 = vld [vmem:[%s3799_s21 + $0x78] sm:$0xff] }
  0x64   : > { %1301 = vmatprep.subr.bf16.mxu1 %v3324_v8  ;;  %1738 = vperm.xlu0 %3230, %v1668_v41   ;;  %v1690_v8 = vld [vmem:[%s3799_s21 + $0xf8] sm:$0xff]  ;;  %v610_v41 = vunpack.c.h.s8.bf16 %v554_v33 }
  0x65   : > { %1818 = vperm.xlu1 %3231, %v1684_v42   ;;  %v612_v42 = vunpack.c.h.s8.bf16 %v556_v34 }
  0x66   : > { %1109 = vmatpush2.bf16.msra.mxu0 %v3326_v9  ;;  %v546_v9 = vld [vmem:[%s3759_s26 + $0x60] sm:$0xff] }
  0x67   : > { %1302 = vmatpush2.bf16.msra.mxu1 %v3327_v12  ;;  %v590_v11 = vunpack.c.l.s8.bf16 %v546_v9  ;;  %v592_v12 = vunpack.c.l.s8.bf16 %v548_v10  ;;  %v594_v17 = vunpack.c.h.s8.bf16 %v546_v9  ;;  %v2154_v10 = vld [vmem:[#allocation3 + $0x78] sm:$0xff] }
  0x68   : > { %1743 = vperm.xlu0 %3230, %v1669_v47   ;;  %3047 = vmatprep.subr.mxu0 %v2154_v10 }
  0x69   : > { %1111 = vmatmul.mubr.bf16.vlgmr.msra.gmra.mxu0 %v566_v15  ;;  %1823 = vperm.xlu1 %3231, %v1685_v48   ;;  %v551_v15 = vld [vmem:[%s3759_s26 + $0x88] sm:$0xff] }
  0x6a   : > { %1304 = vmatmul.mubr.bf16.vlgmr.msra.gmra.mxu1 %v568_v16  ;;  %1120 = vmatprep.mubr.bf16.mxu0 %v571_v19  ;;  %v553_v16 = vld [vmem:[%s3759_s26 + $0x98] sm:$0xff]  ;;  %v599_v19 = vunpack.c.l.s8.bf16 %v551_v15 }
  0x6b   : > { %1313 = vmatprep.mubr.bf16.mxu1 %v573_v20  ;;  %v601_v20 = vunpack.c.l.s8.bf16 %v553_v16  ;;  %3127 = vmatprep.subr.mxu1 %v2154_v10 }
  0x6c   : > { %1748 = vperm.xlu0 %3230, %v1670_v51   ;;  %v563_v51 = vld [vmem:[%s3759_s26 + $0xe8] sm:$0xff]  ;;  %3048 = vmatpush3.msra.mxu0 %v2154_v10 }
  0x6d   : > { %1828 = vperm.xlu1 %3231, %v1686_v52   ;;  %v565_v52 = vld [vmem:[%s3759_s26 + $0xf8] sm:$0xff]  ;;  %3143 = vmatpush3.msra.mxu1 %v2154_v10 }
  0x70   : > { %1753 = vperm.xlu0 %3230, %v1671_v57   ;;  %v562_v57 = vld [vmem:[%s3759_s26 + $0xe0] sm:$0xff] }
  0x71   : > { %1121 = vmatmul.mubr.bf16.gmra.mxu0 %v570_v25  ;;  %1833 = vperm.xlu1 %3231, %v1687_v58   ;;  %v603_v25 = vunpack.c.h.s8.bf16 %v551_v15  ;;  %v564_v58 = vld [vmem:[%s3759_s26 + $0xf0] sm:$0xff]  ;;  %v626_v63 = vunpack.c.h.s8.bf16 %v562_v57 }
  0x72   : > { %1314 = vmatmul.mubr.bf16.gmra.mxu1 %v572_v26  ;;  %1130 = vmatprep.mubr.bf16.mxu0 %v575_v29  ;;  %v605_v26 = vunpack.c.h.s8.bf16 %v553_v16  ;;  %v602_v29 = vunpack.c.h.s8.bf16 %v550_v21  ;;  %v628_v0 = vunpack.c.h.s8.bf16 %v564_v58 }
  0x73   : > { %1323 = vmatprep.mubr.bf16.mxu1 %v577_v30  ;;  %v604_v30 = vunpack.c.h.s8.bf16 %v552_v22 }
  0x74   : > { %1758 = vperm.xlu0 %3230, %v1672_v61   ;;  %v627_v61 = vunpack.c.h.s8.bf16 %v563_v51 }
  0x75   : > { %1838 = vperm.xlu1 %3231, %v1688_v62   ;;  %v629_v62 = vunpack.c.h.s8.bf16 %v565_v52 }
  0x78   : > { %1763 = vperm.xlu0 %3230, %v1673_v3  }
  0x79   : > { %1131 = vmatmul.mubr.bf16.gmra.mxu0 %v574_v35  ;;  %1843 = vperm.xlu1 %3231, %v1689_v4   ;;  %v606_v35 = vunpack.c.l.s8.bf16 %v554_v33  ;;  %v2153_v33 = vld [vmem:[#allocation3 + $0x70] sm:$0xff] }
  0x7a   : > { %1324 = vmatmul.mubr.bf16.gmra.mxu1 %v576_v36  ;;  %1140 = vmatprep.mubr.bf16.mxu0 %v579_v39  ;;  %v608_v36 = vunpack.c.l.s8.bf16 %v556_v34  ;;  %v559_v39 = vld [vmem:[%s3759_s26 + $0xc8] sm:$0xff] }
  0x7b   : > { %1333 = vmatprep.mubr.bf16.mxu1 %v581_v40  ;;  %v561_v40 = vld [vmem:[%s3759_s26 + $0xd8] sm:$0xff]  ;;  %v615_v43 = vunpack.c.l.s8.bf16 %v559_v39  ;;  %v2152_v34 = vld [vmem:[#allocation3 + $0x68] sm:$0xff]  ;;  %3049 = vmatprep.subr.mxu0 %v2153_v33 }
  0x7c   : > { %1768 = vperm.xlu0 %3230, %v1674_v7   ;;  %v617_v44 = vunpack.c.l.s8.bf16 %v561_v40  ;;  %3128 = vmatprep.subr.mxu1 %v2153_v33 }
  0x7d   : > { %1848 = vperm.xlu1 %3231, %v1690_v8   ;;  %3050 = vmatpush3.msra.mxu0 %v2153_v33 }
  0x7e   : > { %3144 = vmatpush3.msra.mxu1 %v2153_v33  ;;  %3051 = vmatprep.subr.mxu0 %v2152_v34  ;;  %v2144_v33 = vld [vmem:[#allocation3 + $0x28] sm:$0xff] }
  0x7f   : > { %3052 = vmatpush3.msra.mxu0 %v2152_v34  ;;  %3129 = vmatprep.subr.mxu1 %v2152_v34 }
  0x80   : > { %3145 = vmatpush3.msra.mxu1 %v2152_v34 }
  0x81   : > { %1141 = vmatmul.mubr.bf16.gmra.mxu0 %v578_v45  ;;  %v558_v45 = vld [vmem:[%s3759_s26 + $0xc0] sm:$0xff] }
  0x82   : > { %1334 = vmatmul.mubr.bf16.gmra.mxu1 %v580_v46  ;;  %1150 = vmatprep.mubr.bf16.mxu0 %v583_v49  ;;  %v560_v46 = vld [vmem:[%s3759_s26 + $0xd0] sm:$0xff]  ;;  %v614_v47 = vunpack.c.l.s8.bf16 %v558_v45  ;;  %v619_v49 = vunpack.c.h.s8.bf16 %v559_v39  ;;  %v618_v53 = vunpack.c.h.s8.bf16 %v558_v45  ;;  %s3913_s26 = scalar_lea.vmem %s4560_s2, %s3780_s6  ;;  %v2151_v45 = vld [vmem:[#allocation3 + $0x60] sm:$0xff]  ;;  %s419_s6 = sand.u32 1, %s3482_s28  }
  0x83   : > { %1343 = vmatprep.mubr.bf16.mxu1 %v585_v50  ;;  %v616_v48 = vunpack.c.l.s8.bf16 %v560_v46  ;;  %v621_v50 = vunpack.c.h.s8.bf16 %v561_v40  ;;  %v620_v54 = vunpack.c.h.s8.bf16 %v560_v46  ;;  %v1883_v7 = vld [vmem:[%s3913_s26] sm:$0xff]  ;;  %v2150_v46 = vld [vmem:[#allocation3 + $0x58] sm:$0xff]  ;;  %3053 = vmatprep.subr.mxu0 %v2151_v45  ;;  %s2915_s12 = sshll.u32 %s419_s6, 8  ;;  %s4513_s30 = scalar_lea.sflag [#allocation5], %s419_s6 }
  0x84   : > { %3054 = vmatpush3.msra.mxu0 %v2151_v45  ;;  %3130 = vmatprep.subr.mxu1 %v2151_v45  ;;  %v1890_v34 = vld [vmem:[%s3913_s26 + $0x38] sm:$0xff]  ;;  %s4370_s21 = scalar_lea.vmem [#allocation6], %s2915_s12 }
  0x85   : > { %3055 = vmatprep.subr.mxu0 %v2150_v46  ;;  %3146 = vmatpush3.msra.mxu1 %v2151_v45 }
  0x86   : > { %3056 = vmatpush3.msra.mxu0 %v2150_v46  ;;  %3131 = vmatprep.subr.mxu1 %v2150_v46 }
  0x87   : > { %3147 = vmatpush3.msra.mxu1 %v2150_v46  ;;  %v2142_v46 = vld [vmem:[#allocation3 + $0x18] sm:$0xff] }
  0x89   : > { %1151 = vmatmul.mubr.bf16.gmra.mxu0 %v582_v55  ;;  %v623_v55 = vunpack.c.l.s8.bf16 %v563_v51 }
  0x8a   : > { %1344 = vmatmul.mubr.bf16.gmra.mxu1 %v584_v56  ;;  %1160 = vmatprep.mubr.bf16.mxu0 %v587_v59  ;;  %v625_v56 = vunpack.c.l.s8.bf16 %v565_v52  ;;  %v622_v59 = vunpack.c.l.s8.bf16 %v562_v57 }
  0x8b   : > { %1353 = vmatprep.mubr.bf16.mxu1 %v589_v60  ;;  %v624_v60 = vunpack.c.l.s8.bf16 %v564_v58  ;;  %v2149_v58 = vld [vmem:[#allocation3 + $0x50] sm:$0xff] }
  0x8c   : > { %3057 = vmatprep.subr.mxu0 %v2149_v58  ;;  %3132 = vmatprep.subr.mxu1 %v2149_v58 }
  0x8d   : > { %3058 = vmatpush3.msra.mxu0 %v2149_v58  ;;  %3148 = vmatpush3.msra.mxu1 %v2149_v58 }
  0x91   : > { %1161 = vmatmul.mubr.bf16.gmra.mxu0 %v586_v1 }
  0x92   : > { %1354 = vmatmul.mubr.bf16.gmra.mxu1 %v588_v2  ;;  %1170 = vmatprep.mubr.bf16.mxu0 %v591_v5 }
  0x93   : > { %1363 = vmatprep.mubr.bf16.mxu1 %v593_v6 }
  0x99   : > { %1171 = vmatmul.mubr.bf16.gmra.mxu0 %v590_v11 }
  0x9a   : > { %1364 = vmatmul.mubr.bf16.gmra.mxu1 %v592_v12  ;;  %1180 = vmatprep.mubr.bf16.mxu0 %v595_v13 }
  0x9b   : > { %1373 = vmatprep.mubr.bf16.mxu1 %v597_v14 }
  0xa1   : > { %1181 = vmatmul.mubr.bf16.gmra.mxu0 %v594_v17 }
  0xa2   : > { %1374 = vmatmul.mubr.bf16.gmra.mxu1 %v596_v18  ;;  %1190 = vmatprep.mubr.bf16.mxu0 %v599_v19  ;;  %v1884_v19 = vld [vmem:[%s3913_s26 + $0x8] sm:$0xff] }
  0xa3   : > { %1383 = vmatprep.mubr.bf16.mxu1 %v601_v20 }
  0xa9   : > { %1191 = vmatmul.mubr.bf16.gmra.mxu0 %v598_v23 }
  0xaa   : > { %1384 = vmatmul.mubr.bf16.gmra.mxu1 %v600_v24  ;;  %1200 = vmatprep.mubr.bf16.mxu0 %v603_v25 }
  0xab   : > { %1393 = vmatprep.mubr.bf16.mxu1 %v605_v26 }
  0xb1   : > { %1201 = vmatmul.mubr.bf16.gmra.mxu0 %v602_v29 }
  0xb2   : > { %1394 = vmatmul.mubr.bf16.gmra.mxu1 %v604_v30  ;;  %1210 = vmatprep.mubr.bf16.mxu0 %v607_v31  ;;  %v1885_v30 = vld [vmem:[%s3913_s26 + $0x10] sm:$0xff] }
  0xb3   : > { %1403 = vmatprep.mubr.bf16.mxu1 %v609_v32 }
  0xb9   : > { %1211 = vmatmul.mubr.bf16.gmra.mxu0 %v606_v35 }
  0xba   : > { %1404 = vmatmul.mubr.bf16.gmra.mxu1 %v608_v36  ;;  %1220 = vmatprep.mubr.bf16.mxu0 %v611_v37 }
  0xbb   : > { %1413 = vmatprep.mubr.bf16.mxu1 %v613_v38  ;;  %v1694_v1 = vpop.permute.xlu0 %1693 }
  0xbc   : > { %v1699_v13 = vpop.permute.xlu1 %1698 }
  0xbf   : > { %v3907_v2 = vpop.permute.xlu0 %1773 }
  0xc1   : > { %1221 = vmatmul.mubr.bf16.gmra.mxu0 %v610_v41 }
  0xc2   : > { %1414 = vmatmul.mubr.bf16.gmra.mxu1 %v612_v42  ;;  %1230 = vmatprep.mubr.bf16.mxu0 %v615_v43  ;;  %v1886_v42 = vld [vmem:[%s3913_s26 + $0x18] sm:$0xff] }
  0xc3   : > { %1423 = vmatprep.mubr.bf16.mxu1 %v617_v44  ;;  %v1704_v3 = vpop.permute.xlu0 %1703 }
  0xc7   : > { %v1709_v14 = vpop.permute.xlu0 %1708 }
  0xc9   : > { %1231 = vmatmul.mubr.bf16.gmra.mxu0 %v614_v47 }
  0xca   : > { %1424 = vmatmul.mubr.bf16.gmra.mxu1 %v616_v48  ;;  %1240 = vmatprep.mubr.bf16.mxu0 %v619_v49 }
  0xcb   : > { %1433 = vmatprep.mubr.bf16.mxu1 %v621_v50  ;;  %v1714_v29 = vpop.permute.xlu0 %1713 }
  0xcf   : > { %v1719_v50 = vpop.permute.xlu0 %1718 }
  0xd1   : > { %1241 = vmatmul.mubr.bf16.gmra.mxu0 %v618_v53 }
  0xd2   : > { %1434 = vmatmul.mubr.bf16.gmra.mxu1 %v620_v54  ;;  %1250 = vmatprep.mubr.bf16.mxu0 %v623_v55  ;;  %v1887_v55 = vld [vmem:[%s3913_s26 + $0x20] sm:$0xff] }
  0xd3   : > { %1443 = vmatprep.mubr.bf16.mxu1 %v625_v56 }
  0xd9   : > { %1251 = vmatmul.mubr.bf16.gmra.mxu0 %v622_v59 }
  0xda   : > { %1444 = vmatmul.mubr.bf16.gmra.mxu1 %v624_v60  ;;  %1260 = vmatprep.mubr.bf16.mxu0 %v627_v61 }
  0xdb   : > { %1453 = vmatprep.mubr.bf16.mxu1 %v629_v62 }
  0xe1   : > { %1261 = vmatmul.mubr.bf16.gmra.mxu0 %v626_v63 }
  0xe2   : > { %1454 = vmatmul.mubr.bf16.gmra.mxu1 %v628_v0  ;;  %v2148_v0 = vld [vmem:[#allocation3 + $0x48] sm:$0xff] }
  0xe3   : > { %3059 = vmatprep.subr.mxu0 %v2148_v0  ;;  %3133 = vmatprep.subr.mxu1 %v2148_v0 }
  0xe4   : > { %3060 = vmatpush3.msra.mxu0 %v2148_v0  ;;  %3149 = vmatpush3.msra.mxu1 %v2148_v0  ;;  %v3987_v0 = vpop.permute.xlu1 %1778 }
 0x129   : > { %v1112_v4 = vpop.f32.mrf.mxu0 }
 0x12a   : > { %v1305_v5 = vpop.f32.mrf.mxu1 }
 0x12b   : > { %v1306_v6 = vadd.f32 %v1305_v5, %v1112_v4  ;;  %v1114_v8 = vpop.f32.mrf.mxu0  ;;  %v1724_v4 = vpop.permute.xlu0 %1723  ;;  %v1888_v5 = vld [vmem:[%s3913_s26 + $0x28] sm:$0xff] }
 0x12c   : > { %v1307_v9 = vpop.f32.mrf.mxu1 }
 0x12d   : > { %v1851_v11 = vmul.f32 %v1694_v1, %v1306_v6  ;;  %v3916_v12 = vadd.f32 %v1307_v9, %v1114_v8  ;;  %v1116_v15 = vpop.f32.mrf.mxu0  ;;  %v2147_v8 = vld [vmem:[#allocation3 + $0x40] sm:$0xff] }
 0x12e   : > { %v1309_v16 = vpop.f32.mrf.mxu1  ;;  %3061 = vmatprep.subr.mxu0 %v2147_v8  ;;  %3134 = vmatprep.subr.mxu1 %v2147_v8 }
 0x12f   : > { %v3918_v17 = vadd.f32 %v1883_v7, %v1851_v11  ;;  %v1310_v18 = vadd.f32 %v1309_v16, %v1116_v15  ;;  %v1118_v20 = vpop.f32.mrf.mxu0  ;;  %3062 = vmatpush3.msra.mxu0 %v2147_v8  ;;  %v2146_v15 = vld [vmem:[#allocation3 + $0x38] sm:$0xff]  ;;  %3150 = vmatpush3.msra.mxu1 %v2147_v8 }
 0x130   : > { %v1311_v21 = vpop.f32.mrf.mxu1  ;;  %3063 = vmatprep.subr.mxu0 %v2146_v15  ;;  %3135 = vmatprep.subr.mxu1 %v2146_v15 }
 0x131   : > { %v1852_v22 = vmul.f32 %v1699_v13, %v1310_v18  ;;  %v3921_v23 = vadd.f32 %v1311_v21, %v1118_v20  ;;  %v1947_v24 = vmul.f32 %v3918_v17, %v3918_v17  ;;  %v1122_v25 = vpop.f32.mrf.mxu0  ;;  %3064 = vmatpush3.msra.mxu0 %v2146_v15  ;;  %3151 = vmatpush3.msra.mxu1 %v2146_v15 }
 0x132   : > { %v1315_v26 = vpop.f32.mrf.mxu1 }
 0x133   : > { %v3925_v27 = vadd.f32 %v1884_v19, %v1852_v22  ;;  %v1316_v28 = vadd.f32 %v1315_v26, %v1122_v25  ;;  %1979 = vadd.xlane.f32.xlu0 %v1947_v24  ;;  %v1124_v31 = vpop.f32.mrf.mxu0  ;;  %v1889_v19 = vld [vmem:[%s3913_s26 + $0x30] sm:$0xff] }
 0x134   : > { %v1317_v32 = vpop.f32.mrf.mxu1  ;;  %v2145_v22 = vld [vmem:[#allocation3 + $0x30] sm:$0xff] }
 0x135   : > { %v1853_v35 = vmul.f32 %v1704_v3, %v1316_v28  ;;  %v3928_v36 = vadd.f32 %v1317_v32, %v1124_v31  ;;  %v1948_v37 = vmul.f32 %v3925_v27, %v3925_v27  ;;  %v1126_v38 = vpop.f32.mrf.mxu0  ;;  %v1729_v28 = vpop.permute.xlu0 %1728  ;;  %3065 = vmatprep.subr.mxu0 %v2145_v22  ;;  %3136 = vmatprep.subr.mxu1 %v2145_v22 }
 0x136   : > { %v1319_v39 = vpop.f32.mrf.mxu1  ;;  %3066 = vmatpush3.msra.mxu0 %v2145_v22  ;;  %3152 = vmatpush3.msra.mxu1 %v2145_v22 }
 0x137   : > { %v3932_v40 = vadd.f32 %v1885_v30, %v1853_v35  ;;  %v1320_v41 = vadd.f32 %v1319_v39, %v1126_v38  ;;  %1981 = vadd.xlane.f32.xlu0 %v1948_v37  ;;  %v1128_v43 = vpop.f32.mrf.mxu0  ;;  %3067 = vmatprep.subr.mxu0 %v2144_v33 }
 0x138   : > { %v1321_v44 = vpop.f32.mrf.mxu1  ;;  %3068 = vmatpush3.msra.mxu0 %v2144_v33  ;;  %3137 = vmatprep.subr.mxu1 %v2144_v33 }
 0x139   : > { %v1854_v47 = vmul.f32 %v1709_v14, %v1320_v41  ;;  %v3935_v48 = vadd.f32 %v1321_v44, %v1128_v43  ;;  %v1949_v49 = vmul.f32 %v3932_v40, %v3932_v40  ;;  %v1132_v51 = vpop.f32.mrf.mxu0  ;;  %3153 = vmatpush3.msra.mxu1 %v2144_v33 }
 0x13a   : > { %v1325_v52 = vpop.f32.mrf.mxu1 }
 0x13b   : > { %v3939_v53 = vadd.f32 %v1886_v42, %v1854_v47  ;;  %v1326_v54 = vadd.f32 %v1325_v52, %v1132_v51  ;;  %1983 = vadd.xlane.f32.xlu1 %v1949_v49  ;;  %v1134_v56 = vpop.f32.mrf.mxu0  ;;  %v2143_v42 = vld [vmem:[#allocation3 + $0x20] sm:$0xff]  ;;  %v2141_v52 = vld [vmem:[#allocation3 + $0x10] sm:$0xff] }
 0x13c   : > { %v1327_v57 = vpop.f32.mrf.mxu1  ;;  %3069 = vmatprep.subr.mxu0 %v2143_v42  ;;  %3138 = vmatprep.subr.mxu1 %v2143_v42 }
 0x13d   : > { %v1855_v59 = vmul.f32 %v1714_v29, %v1326_v54  ;;  %v3942_v60 = vadd.f32 %v1327_v57, %v1134_v56  ;;  %v1950_v61 = vmul.f32 %v3939_v53, %v3939_v53  ;;  %v1136_v62 = vpop.f32.mrf.mxu0  ;;  %3070 = vmatpush3.msra.mxu0 %v2143_v42  ;;  %v2140_v56 = vld [vmem:[#allocation3 + $0x8] sm:$0xff]  ;;  %3154 = vmatpush3.msra.mxu1 %v2143_v42 }
 0x13e   : > { %v1329_v63 = vpop.f32.mrf.mxu1  ;;  %3071 = vmatprep.subr.mxu0 %v2142_v46  ;;  %3139 = vmatprep.subr.mxu1 %v2142_v46 }
 0x13f   : > { %v3946_v1 = vadd.f32 %v1887_v55, %v1855_v59  ;;  %v1330_v3 = vadd.f32 %v1329_v63, %v1136_v62  ;;  %1985 = vadd.xlane.f32.xlu1 %v1950_v61  ;;  %v1138_v6 = vpop.f32.mrf.mxu0  ;;  %3072 = vmatpush3.msra.mxu0 %v2142_v46  ;;  %v2139_v61 = vld [vmem:[#allocation3] sm:$0xff] }
 0x140   : > { %v1331_v7 = vpop.f32.mrf.mxu1  ;;  %3073 = vmatprep.subr.mxu0 %v2141_v52  ;;  %3155 = vmatpush3.msra.mxu1 %v2142_v46 }
 0x141   : > { %v1856_v9 = vmul.f32 %v1719_v50, %v1330_v3  ;;  %v3949_v10 = vadd.f32 %v1331_v7, %v1138_v6  ;;  %v1951_v11 = vmul.f32 %v3946_v1, %v3946_v1  ;;  %v1142_v13 = vpop.f32.mrf.mxu0  ;;  %3074 = vmatpush3.msra.mxu0 %v2141_v52  ;;  %3140 = vmatprep.subr.mxu1 %v2141_v52 }
 0x142   : > { %v1335_v14 = vpop.f32.mrf.mxu1  ;;  %3075 = vmatprep.subr.mxu0 %v2140_v56  ;;  %3156 = vmatpush3.msra.mxu1 %v2141_v52 }
 0x143   : > { %v3953_v16 = vadd.f32 %v1888_v5, %v1856_v9  ;;  %v1336_v18 = vadd.f32 %v1335_v14, %v1142_v13  ;;  %1987 = vadd.xlane.f32.xlu1 %v1951_v11  ;;  %v1144_v20 = vpop.f32.mrf.mxu0  ;;  %3076 = vmatpush3.msra.mxu0 %v2140_v56  ;;  %v3995_v11 = vpop.permute.xlu1 %1783 }
 0x144   : > { %v1337_v21 = vpop.f32.mrf.mxu1  ;;  %3077 = vmatprep.subr.mxu0 %v2139_v61  ;;  %3141 = vmatprep.subr.mxu1 %v2140_v56 }
 0x145   : > { %v1857_v24 = vmul.f32 %v1724_v4, %v1336_v18  ;;  %v3956_v25 = vadd.f32 %v1337_v21, %v1144_v20  ;;  %v1952_v26 = vmul.f32 %v3953_v16, %v3953_v16  ;;  %v1146_v29 = vpop.f32.mrf.mxu0  ;;  %3078 = vmatpush3.msra.mxu0 %v2139_v61  ;;  %v1734_v18 = vpop.permute.xlu0 %1733  ;;  %3157 = vmatpush3.msra.mxu1 %v2140_v56 }
 0x146   : > { %v1339_v30 = vpop.f32.mrf.mxu1  ;;  %3142 = vmatprep.subr.mxu1 %v2139_v61 }
 0x147   : > { %v3960_v31 = vadd.f32 %v1889_v19, %v1857_v24  ;;  %v1340_v32 = vadd.f32 %v1339_v30, %v1146_v29  ;;  %1989 = vadd.xlane.f32.xlu1 %v1952_v26  ;;  %v1148_v35 = vpop.f32.mrf.mxu0  ;;  %v4009_v26 = vpop.permute.xlu1 %1788  ;;  %3158 = vmatpush3.msra.mxu1 %v2139_v61 }
 0x148   : > { %v1341_v37 = vpop.f32.mrf.mxu1 }
 0x149   : > { %v1858_v38 = vmul.f32 %v1729_v28, %v1340_v32  ;;  %v3963_v39 = vadd.f32 %v1341_v37, %v1148_v35  ;;  %v1953_v41 = vmul.f32 %v3960_v31, %v3960_v31  ;;  %v3967_v43 = vpop.f32.mrf.mxu0  ;;  %v1739_v30 = vpop.permute.xlu0 %1738 }
 0x14a   : > { %v3969_v44 = vpop.f32.mrf.mxu1 }
 0x14b   : > { %v3971_v45 = vadd.f32 %v1890_v34, %v1858_v38  ;;  %1991 = vadd.xlane.f32.xlu1 %v1953_v41  ;;  %v1154_v47 = vpop.f32.mrf.mxu0  ;;  %v4017_v38 = vpop.permute.xlu1 %1793 }
 0x14c   : > { %v1347_v49 = vpop.f32.mrf.mxu1 }
 0x14d   : > { %4589 = vst [vmem:[#allocation9_spill] sm:$0xff] %v3971_v45  ;;  %v3973_v50 = vadd.f32 %v1347_v49, %v1154_v47  ;;  %v1954_v51 = vmul.f32 %v3971_v45, %v3971_v45  ;;  %v3977_v54 = vpop.f32.mrf.mxu0  ;;  %v1744_v47 = vpop.permute.xlu0 %1743  ;;  %v1346_v49 = vadd.f32 %v3969_v44, %v3967_v43 }
 0x14e   : > { %v3979_v55 = vpop.f32.mrf.mxu1 }
 0x14f   : > { %1993 = vadd.xlane.f32.xlu1 %v1954_v51  ;;  %v1158_v57 = vpop.f32.mrf.mxu0  ;;  %v4029_v61 = vpop.permute.xlu1 %1798 }
 0x150   : > { %v1351_v58 = vpop.f32.mrf.mxu1 }
 0x151   : > { %v3981_v59 = vadd.f32 %v1351_v58, %v1158_v57  ;;  %v3983_v62 = vpop.f32.mrf.mxu0  ;;  %v1749_v43 = vpop.permute.xlu0 %1748 }
 0x152   : > { %v3985_v63 = vpop.f32.mrf.mxu1 }
 0x153   : > { %v1164_v3 = vpop.f32.mrf.mxu0  ;;  %v4045_v45 = vpop.permute.xlu1 %1803 }
 0x154   : > { %v1357_v4 = vpop.f32.mrf.mxu1 }
 0x155   : > { %v3989_v5 = vadd.f32 %v1357_v4, %v1164_v3  ;;  %v3991_v6 = vpop.f32.mrf.mxu0  ;;  %v1859_v4 = vmul.f32 %v1734_v18, %v1346_v49 }
 0x156   : > { %v3993_v7 = vpop.f32.mrf.mxu1 }
 0x157   : > { %v1168_v8 = vpop.f32.mrf.mxu0 }
 0x158   : > { %v1361_v9 = vpop.f32.mrf.mxu1 }
 0x159   : > { %v3997_v13 = vadd.f32 %v1361_v9, %v1168_v8  ;;  %v3999_v14 = vpop.f32.mrf.mxu0  ;;  %v1350_v8 = vadd.f32 %v3979_v55, %v3977_v54  ;;  %v1356_v54 = vadd.f32 %v3985_v63, %v3983_v62 }
 0x15a   : > { %v4001_v15 = vpop.f32.mrf.mxu1 }
 0x15b   : > { %v1174_v19 = vpop.f32.mrf.mxu0  ;;  %v1860_v49 = vmul.f32 %v1739_v30, %v1350_v8  ;;  %v1754_v8 = vpop.permute.xlu0 %1753 }
 0x15c   : > { %v1367_v20 = vpop.f32.mrf.mxu1 }
 0x15d   : > { %v4003_v21 = vadd.f32 %v1367_v20, %v1174_v19  ;;  %v4005_v22 = vpop.f32.mrf.mxu0  ;;  %v1899_v20 = vld [vmem:[%s3913_s26 + $0x80] sm:$0xff] }
 0x15e   : > { %v4007_v24 = vpop.f32.mrf.mxu1 }
 0x15f   : > { %v1178_v28 = vpop.f32.mrf.mxu0 }
 0x160   : > { %v1371_v29 = vpop.f32.mrf.mxu1 }
 0x161   : > { %v4011_v32 = vadd.f32 %v1371_v29, %v1178_v28  ;;  %v4013_v33 = vpop.f32.mrf.mxu0  ;;  %v1891_v28 = vld [vmem:[%s3913_s26 + $0x40] sm:$0xff] }
 0x162   : > { %v4015_v34 = vpop.f32.mrf.mxu1  ;;  %v4040_v18 = vadd.f32 %v1891_v28, %v1859_v4  ;;  %v1861_v28 = vmul.f32 %v1744_v47, %v1356_v54  ;;  %v4068_v54 = vpop.permute.xlu1 %1808 }
 0x163   : > { %v1184_v35 = vpop.f32.mrf.mxu0 }
 0x164   : > { %v1377_v37 = vpop.f32.mrf.mxu1 }
 0x165   : > { %v4019_v41 = vadd.f32 %v1377_v37, %v1184_v35  ;;  %v4021_v42 = vpop.f32.mrf.mxu0 }
 0x166   : > { %v4023_v46 = vpop.f32.mrf.mxu1 }
 0x167   : > { %v1188_v51 = vpop.f32.mrf.mxu0 }
 0x168   : > { %v1381_v52 = vpop.f32.mrf.mxu1 }
 0x169   : > { %v4027_v56 = vadd.f32 %v1381_v52, %v1188_v51  ;;  %v1192_v57 = vpop.f32.mrf.mxu0 }
 0x16a   : > { %v1385_v58 = vpop.f32.mrf.mxu1 }
 0x16b   : > { %v1386_v3 = vadd.f32 %v1385_v58, %v1192_v57  ;;  %v1194_v9 = vpop.f32.mrf.mxu0  ;;  %v1900_v58 = vld [vmem:[%s3913_s26 + $0x88] sm:$0xff] }
 0x16c   : > { %v1387_v19 = vpop.f32.mrf.mxu1 }
 0x16d   : > { %v1867_v44 = vmul.f32 %v3907_v2, %v1386_v3  ;;  %v4036_v29 = vadd.f32 %v1387_v19, %v1194_v9  ;;  %v1196_v35 = vpop.f32.mrf.mxu0  ;;  %v1892_v2 = vld [vmem:[%s3913_s26 + $0x48] sm:$0xff] }
 0x16e   : > { %v1389_v37 = vpop.f32.mrf.mxu1  ;;  %v4055_v63 = vadd.f32 %v1892_v2, %v1860_v49 }
 0x16f   : > { %v1390_v51 = vadd.f32 %v1389_v37, %v1196_v35  ;;  %v4038_v52 = vadd.f32 %v1899_v20, %v1867_v44  ;;  %v1198_v55 = vpop.f32.mrf.mxu0  ;;  %v1901_v37 = vld [vmem:[%s3913_s26 + $0x90] sm:$0xff] }
 0x170   : > { %v1391_v57 = vpop.f32.mrf.mxu1 }
 0x171   : > { %v1868_v3 = vmul.f32 %v3987_v0, %v1390_v51  ;;  %v4049_v9 = vadd.f32 %v1391_v57, %v1198_v55  ;;  %v1963_v4 = vmul.f32 %v4038_v52, %v4038_v52  ;;  %v1202_v19 = vpop.f32.mrf.mxu0  ;;  %v1955_v0 = vmul.f32 %v4040_v18, %v4040_v18  ;;  %v1893_v51 = vld [vmem:[%s3913_s26 + $0x50] sm:$0xff] }
 0x172   : > { %v1395_v30 = vpop.f32.mrf.mxu1  ;;  %v1360_v55 = vadd.f32 %v3993_v7, %v3991_v6  ;;  %v1366_v6 = vadd.f32 %v4001_v15, %v3999_v14 }
 0x173   : > { %v1396_v20 = vadd.f32 %v1395_v30, %v1202_v19  ;;  %2011 = vadd.xlane.f32.xlu1 %v1963_v4  ;;  %v4053_v62 = vadd.f32 %v1900_v58, %v1868_v3  ;;  %v1204_v44 = vpop.f32.mrf.mxu0  ;;  %v4072_v4 = vadd.f32 %v1893_v51, %v1861_v28  ;;  %v1956_v30 = vmul.f32 %v4055_v63, %v4055_v63 }
 0x174   : > { %v1397_v35 = vpop.f32.mrf.mxu1 }
 0x175   : > { %v1869_v57 = vmul.f32 %v3995_v11, %v1396_v20  ;;  %v4064_v19 = vadd.f32 %v1397_v35, %v1204_v44  ;;  %v1964_v49 = vmul.f32 %v4053_v62, %v4053_v62  ;;  %v1206_v58 = vpop.f32.mrf.mxu0  ;;  %v1902_v20 = vld [vmem:[%s3913_s26 + $0x98] sm:$0xff]  ;;  %v1862_v44 = vmul.f32 %v1749_v43, %v1360_v55  ;;  %v1759_v35 = vpop.permute.xlu0 %1758 }
 0x176   : > { %v1399_v47 = vpop.f32.mrf.mxu1  ;;  %v1370_v43 = vadd.f32 %v4007_v24, %v4005_v22 }
 0x177   : > { %v1400_v2 = vadd.f32 %v1399_v47, %v1206_v58  ;;  %1995 = vadd.xlane.f32.xlu1 %v1955_v0  ;;  %2013 = vadd.xlane.f32.xlu0 %v1964_v49  ;;  %v4070_v3 = vadd.f32 %v1901_v37, %v1869_v57  ;;  %v1208_v7 = vpop.f32.mrf.mxu0  ;;  %v1894_v37 = vld [vmem:[%s3913_s26 + $0x58] sm:$0xff]  ;;  %v1863_v49 = vmul.f32 %v1754_v8, %v1366_v6 }
 0x178   : > { %v1401_v11 = vpop.f32.mrf.mxu1  ;;  %v1957_v47 = vmul.f32 %v4072_v4, %v4072_v4 }
 0x179   : > { %4590 = vst [vmem:[#allocation10_spill] sm:$0xff] %v4070_v3  ;;  %v1870_v58 = vmul.f32 %v4009_v26, %v1400_v2  ;;  %v4080_v0 = vadd.f32 %v1401_v11, %v1208_v7  ;;  %v1965_v28 = vmul.f32 %v4070_v3, %v4070_v3  ;;  %v1212_v51 = vpop.f32.mrf.mxu0  ;;  %v1903_v2 = vld [vmem:[%s3913_s26 + $0xa0] sm:$0xff]  ;;  %v4092_v7 = vpop.permute.xlu1 %1813  ;;  %v4094_v11 = vadd.f32 %v1894_v37, %v1862_v44 }
 0x17a   : > { %v1405_v14 = vpop.f32.mrf.mxu1  ;;  %v1895_v3 = vld [vmem:[%s3913_s26 + $0x60] sm:$0xff]  ;;  %v1764_v6 = vpop.permute.xlu0 %1763  ;;  %v1864_v37 = vmul.f32 %v1759_v35, %v1370_v43 }
 0x17b   : > { %v1406_v15 = vadd.f32 %v1405_v14, %v1212_v51  ;;  %1997 = vadd.xlane.f32.xlu1 %v1956_v30  ;;  %2015 = vadd.xlane.f32.xlu0 %v1965_v28  ;;  %v4085_v57 = vadd.f32 %v1902_v20, %v1870_v58  ;;  %v1214_v55 = vpop.f32.mrf.mxu0  ;;  %v4104_v44 = vadd.f32 %v1895_v3, %v1863_v49 }
 0x17c   : > { %v1407_v26 = vpop.f32.mrf.mxu1 }
 0x17d   : > { %4591 = vst [vmem:[#allocation11_spill] sm:$0xff] %v4085_v57  ;;  %v1871_v30 = vmul.f32 %v4017_v38, %v1406_v15  ;;  %v4098_v20 = vadd.f32 %v1407_v26, %v1214_v55  ;;  %v1966_v22 = vmul.f32 %v4085_v57, %v4085_v57  ;;  %v1216_v24 = vpop.f32.mrf.mxu0  ;;  %4593 = vst [vmem:[#allocation13_spill] sm:$0xff] %v4104_v44  ;;  %v1904_v15 = vld [vmem:[%s3913_s26 + $0xa8] sm:$0xff]  ;;  %v1819_v43 = vpop.permute.xlu1 %1818 }
 0x17e   : > { %v1409_v8 = vpop.f32.mrf.mxu1  ;;  %v1376_v38 = vadd.f32 %v4015_v34, %v4013_v33  ;;  %v1896_v55 = vld [vmem:[%s3913_s26 + $0x68] sm:$0xff] }
 0x17f   : > { %v1410_v58 = vadd.f32 %v1409_v8, %v1216_v24  ;;  %1999 = vadd.xlane.f32.xlu1 %v1957_v47  ;;  %2017 = vadd.xlane.f32.xlu0 %v1966_v22  ;;  %v4102_v28 = vadd.f32 %v1903_v2, %v1871_v30  ;;  %v1218_v51 = vpop.f32.mrf.mxu0  ;;  %v1958_v47 = vmul.f32 %v4094_v11, %v4094_v11  ;;  %v1905_v8 = vld [vmem:[%s3913_s26 + $0xb0] sm:$0xff] }
 0x180   : > { %v1411_v14 = vpop.f32.mrf.mxu1  ;;  %v4119_v2 = vadd.f32 %v1896_v55, %v1864_v37  ;;  %v1959_v24 = vmul.f32 %v4104_v44, %v4104_v44 }
 0x181   : > { %4592 = vst [vmem:[#allocation12_spill] sm:$0xff] %v4102_v28  ;;  %v1872_v26 = vmul.f32 %v4029_v61, %v1410_v58  ;;  %v4111_v57 = vadd.f32 %v1411_v14, %v1218_v51  ;;  %v1967_v3 = vmul.f32 %v4102_v28, %v4102_v28  ;;  %v1222_v35 = vpop.f32.mrf.mxu0  ;;  %v1865_v61 = vmul.f32 %v1764_v6, %v1376_v38  ;;  %v1897_v58 = vld [vmem:[%s3913_s26 + $0x70] sm:$0xff]  ;;  %v1769_v14 = vpop.permute.xlu0 %1768 }
 0x182   : > { %v1415_v49 = vpop.f32.mrf.mxu1  ;;  %4595 = vst [vmem:[#allocation15_spill] sm:$0xff] %v4119_v2  ;;  %v1380_v51 = vadd.f32 %v4023_v46, %v4021_v42  ;;  %v1906_v46 = vld [vmem:[%s3913_s26 + $0xb8] sm:$0xff] }
 0x183   : > { %v1416_v33 = vadd.f32 %v1415_v49, %v1222_v35  ;;  %2001 = vadd.xlane.f32.xlu1 %v1958_v47  ;;  %2019 = vadd.xlane.f32.xlu0 %v1967_v3  ;;  %v4117_v34 = vadd.f32 %v1904_v15, %v1872_v26  ;;  %v1224_v30 = vpop.f32.mrf.mxu0  ;;  %v4134_v26 = vadd.f32 %v1897_v58, %v1865_v61  ;;  %v1824_v49 = vpop.permute.xlu1 %1823 }
 0x184   : > { %v1417_v22 = vpop.f32.mrf.mxu1 }
 0x185   : > { %4594 = vst [vmem:[#allocation14_spill] sm:$0xff] %v4117_v34  ;;  %v1873_v47 = vmul.f32 %v4045_v45, %v1416_v33  ;;  %v4128_v3 = vadd.f32 %v1417_v22, %v1224_v30  ;;  %v1968_v37 = vmul.f32 %v4117_v34, %v4117_v34  ;;  %v1226_v6 = vpop.f32.mrf.mxu0  ;;  %4597 = vst [vmem:[#allocation17_spill] sm:$0xff] %v4134_v26  ;;  %v2453_v34 = vld [vmem:[%s4196_s11 + $0x10] sm:$0xff] }
 0x186   : > { %v1419_v38 = vpop.f32.mrf.mxu1  ;;  %v1960_v45 = vmul.f32 %v4119_v2, %v4119_v2  ;;  %v1866_v33 = vmul.f32 %v1769_v14, %v1380_v51  ;;  %v1961_v51 = vmul.f32 %v4134_v26, %v4134_v26 }
 0x187   : > { %v1420_v15 = vadd.f32 %v1419_v38, %v1226_v6  ;;  %2003 = vadd.xlane.f32.xlu1 %v1959_v24  ;;  %2021 = vadd.xlane.f32.xlu0 %v1968_v37  ;;  %v4132_v55 = vadd.f32 %v1905_v8, %v1873_v47  ;;  %v1228_v35 = vpop.f32.mrf.mxu0  ;;  %v1898_v8 = vld [vmem:[%s3913_s26 + $0x78] sm:$0xff] }
 0x188   : > { %v1421_v42 = vpop.f32.mrf.mxu1  ;;  %v4150_v14 = vadd.f32 %v1898_v8, %v1866_v33  ;;  %v1908_v33 = vld [vmem:[%s3913_s26 + $0xc8] sm:$0xff] }
 0x189   : > { %4596 = vst [vmem:[#allocation16_spill] sm:$0xff] %v4132_v55  ;;  %v1874_v30 = vmul.f32 %v4068_v54, %v1420_v15  ;;  %v4140_v22 = vadd.f32 %v1421_v42, %v1228_v35  ;;  %v1969_v24 = vmul.f32 %v4132_v55, %v4132_v55  ;;  %v1232_v47 = vpop.f32.mrf.mxu0  ;;  %v1907_v54 = vld [vmem:[%s3913_s26 + $0xc0] sm:$0xff] }
 0x18a   : > { %v1425_v61 = vpop.f32.mrf.mxu1  ;;  %4599 = vst [vmem:[#allocation19_spill] sm:$0xff] %v4150_v14 }
 0x18b   : > { %v1426_v58 = vadd.f32 %v1425_v61, %v1232_v47  ;;  %2005 = vadd.xlane.f32.xlu1 %v1960_v45  ;;  %2023 = vadd.xlane.f32.xlu0 %v1969_v24  ;;  %v4145_v37 = vadd.f32 %v1906_v46, %v1874_v30  ;;  %v1234_v6 = vpop.f32.mrf.mxu0  ;;  %v1829_v46 = vpop.permute.xlu1 %1828 }
 0x18c   : > { %v1427_v38 = vpop.f32.mrf.mxu1 }
 0x18d   : > { %4598 = vst [vmem:[#allocation18_spill] sm:$0xff] %v4145_v37  ;;  %v1875_v15 = vmul.f32 %v4092_v7, %v1426_v58  ;;  %v4153_v35 = vadd.f32 %v1427_v38, %v1234_v6  ;;  %v1970_v42 = vmul.f32 %v4145_v37, %v4145_v37  ;;  %v1236_v45 = vpop.f32.mrf.mxu0  ;;  %v1962_v7 = vmul.f32 %v4150_v14, %v4150_v14  ;;  %v2451_v37 = vld [vmem:[%s4196_s11] sm:$0xff] }
 0x18e   : > { %v1429_v24 = vpop.f32.mrf.mxu1 }
 0x18f   : > { %v1430_v30 = vadd.f32 %v1429_v24, %v1236_v45  ;;  %2007 = vadd.xlane.f32.xlu1 %v1961_v51  ;;  %2025 = vadd.xlane.f32.xlu0 %v1970_v42  ;;  %v4157_v47 = vadd.f32 %v1907_v54, %v1875_v15  ;;  %v1238_v61 = vpop.f32.mrf.mxu0 }
 0x190   : > { %v1431_v26 = vpop.f32.mrf.mxu1 }
 0x191   : > { %4600 = vst [vmem:[#allocation20_spill] sm:$0xff] %v4157_v47  ;;  %v1876_v8 = vmul.f32 %v1819_v43, %v1430_v30  ;;  %v4160_v55 = vadd.f32 %v1431_v26, %v1238_v61  ;;  %v1971_v58 = vmul.f32 %v4157_v47, %v4157_v47  ;;  %v1242_v6 = vpop.f32.mrf.mxu0  ;;  %v1909_v43 = vld [vmem:[%s3913_s26 + $0xd0] sm:$0xff]  ;;  %v1834_v26 = vpop.permute.xlu1 %1833 }
 0x192   : > { %v1435_v38 = vpop.f32.mrf.mxu1 }
 0x193   : > { %v1436_v45 = vadd.f32 %v1435_v38, %v1242_v6  ;;  %2009 = vadd.xlane.f32.xlu1 %v1962_v7  ;;  %2027 = vadd.xlane.f32.xlu0 %v1971_v58  ;;  %v4166_v51 = vadd.f32 %v1908_v33, %v1876_v8  ;;  %v1244_v54 = vpop.f32.mrf.mxu0  ;;  %v1910_v8 = vld [vmem:[%s3913_s26 + $0xd8] sm:$0xff] }
 0x194   : > { %v1437_v15 = vpop.f32.mrf.mxu1 }
 0x195   : > { %4601 = vst [vmem:[#allocation21_spill] sm:$0xff] %v4166_v51  ;;  %v1877_v42 = vmul.f32 %v1824_v49, %v1436_v45  ;;  %v4169_v24 = vadd.f32 %v1437_v15, %v1244_v54  ;;  %v1972_v30 = vmul.f32 %v4166_v51, %v4166_v51  ;;  %v1246_v61 = vpop.f32.mrf.mxu0  ;;  %v2387_v45 = vld [vmem:[%s4179_s19] sm:$0xff]  ;;  %v1839_v54 = vpop.permute.xlu1 %1838 }
 0x196   : > { %v1439_v47 = vpop.f32.mrf.mxu1 }
 0x197   : > { %v1440_v14 = vadd.f32 %v1439_v47, %v1246_v61  ;;  %2029 = vadd.xlane.f32.xlu0 %v1972_v30  ;;  %v4173_v6 = vadd.f32 %v1909_v43, %v1877_v42  ;;  %v4181_v49 = vpop.f32.mrf.mxu0  ;;  %v1911_v61 = vld [vmem:[%s3913_s26 + $0xe0] sm:$0xff] }
 0x198   : > { %v4183_v33 = vpop.f32.mrf.mxu1 }
 0x199   : > { %4602 = vst [vmem:[#allocation22_spill] sm:$0xff] %v4173_v6  ;;  %v1878_v7 = vmul.f32 %v1829_v46, %v1440_v14  ;;  %v1973_v47 = vmul.f32 %v4173_v6, %v4173_v6  ;;  %v1252_v58 = vpop.f32.mrf.mxu0 }
 0x19a   : > { %v1445_v38 = vpop.f32.mrf.mxu1 }
 0x19b   : > { %v1446_v15 = vadd.f32 %v1445_v38, %v1252_v58  ;;  %2031 = vadd.xlane.f32.xlu0 %v1973_v47  ;;  %v4189_v43 = vadd.f32 %v1910_v8, %v1878_v7  ;;  %v1254_v42 = vpop.f32.mrf.mxu0  ;;  %v2419_v47 = vmul.f32 %v2387_v45, %v3916_v12  ;;  %v2389_v58 = vld [vmem:[%s4179_s19 + $0x10] sm:$0xff] }
 0x19c   : > { %v1447_v30 = vpop.f32.mrf.mxu1  ;;  %v2421_v45 = vmul.f32 %v2389_v58, %v3928_v36 }
 0x19d   : > { %4603 = vst [vmem:[#allocation23_spill] sm:$0xff] %v4189_v43  ;;  %v1879_v14 = vmul.f32 %v1834_v26, %v1446_v15  ;;  %v4198_v46 = vadd.f32 %v1447_v30, %v1254_v42  ;;  %v1974_v6 = vmul.f32 %v4189_v43, %v4189_v43  ;;  %v1256_v8 = vpop.f32.mrf.mxu0  ;;  %v1912_v15 = vld [vmem:[%s3913_s26 + $0xe8] sm:$0xff]  ;;  %v1844_v42 = vpop.permute.xlu1 %1843 }
 0x19e   : > { %v1449_v7 = vpop.f32.mrf.mxu1  ;;  %v2485_v58 = vadd.f32 %v2453_v34, %v2421_v45  ;;  %v2394_v45 = vld [vmem:[%s4179_s19 + $0x38] sm:$0xff] }
 0x19f   : > { %v1450_v38 = vadd.f32 %v1449_v7, %v1256_v8  ;;  %2033 = vadd.xlane.f32.xlu0 %v1974_v6  ;;  %v4204_v51 = vadd.f32 %v1911_v61, %v1879_v14  ;;  %v4207_v2 = vpop.f32.mrf.mxu0  ;;  %v2483_v6 = vadd.f32 %v2451_v37, %v2419_v47  ;;  %v2390_v61 = vld [vmem:[%s4179_s19 + $0x18] sm:$0xff] }
 0x1a0   : > { %v4209_v26 = vpop.f32.mrf.mxu1  ;;  %v2422_v37 = vmul.f32 %v2390_v61, %v3935_v48 }
 0x1a1   : > { %4604 = vst [vmem:[#allocation24_spill] sm:$0xff] %v4204_v51  ;;  %v1880_v30 = vmul.f32 %v1839_v54, %v1450_v38  ;;  %v1975_v12 = vmul.f32 %v4204_v51, %v4204_v51  ;;  %v1262_v43 = vpop.f32.mrf.mxu0  ;;  %v1913_v54 = vld [vmem:[%s3913_s26 + $0xf0] sm:$0xff] }
 0x1a2   : > { %v1455_v8 = vpop.f32.mrf.mxu1 }
 0x1a3   : > { %v1456_v14 = vadd.f32 %v1455_v8, %v1262_v43  ;;  %2035 = vadd.xlane.f32.xlu0 %v1975_v12  ;;  %v4216_v7 = vadd.f32 %v1912_v15, %v1880_v30  ;;  %v1264_v28 = vpop.f32.mrf.mxu0  ;;  %v2392_v15 = vld [vmem:[%s4179_s19 + $0x28] sm:$0xff]  ;;  %v2454_v8 = vld [vmem:[%s4196_s11 + $0x18] sm:$0xff] }
 0x1a4   : > { %v1457_v44 = vpop.f32.mrf.mxu1  ;;  %2520 = vperm.xlu1 %3231, %v2483_v6   ;;  %v2424_v6 = vmul.f32 %v2392_v15, %v3949_v10  ;;  %v2486_v34 = vadd.f32 %v2454_v8, %v2422_v37  ;;  %v2458_v10 = vld [vmem:[%s4196_s11 + $0x38] sm:$0xff]  ;;  %v2460_v15 = vld [vmem:[%s4196_s11 + $0x48] sm:$0xff] }
 0x1a5   : > { %v1881_v38 = vmul.f32 %v1844_v42, %v1456_v14  ;;  %v4220_v51 = vadd.f32 %v1457_v44, %v1264_v28  ;;  %v1976_v36 = vmul.f32 %v4216_v7, %v4216_v7  ;;  %v1266_v43 = vpop.f32.mrf.mxu0  ;;  %v1849_v42 = vpop.permute.xlu1 %1848  ;;  %v1914_v28 = vld [vmem:[%s3913_s26 + $0xf8] sm:$0xff]  ;;  %v2456_v14 = vld [vmem:[%s4196_s11 + $0x28] sm:$0xff]  ;;  %s2756_s26 = sshll.u32 %s4370_s21, 4  ;;  %s4505_s26 = int_to_ptr.vmem [resolvable:$true] %s2756_s26 }
 0x1a6   : > { %v1459_v47 = vpop.f32.mrf.mxu1  ;;  %s3418_s24 = scalar_lea.vmem %s4505_s26, 4096 }
 0x1a7   : > { %v1460_v30 = vadd.f32 %v1459_v47, %v1266_v43  ;;  %2037 = vadd.xlane.f32.xlu0 %v1976_v36  ;;  %v4226_v12 = vadd.f32 %v1913_v54, %v1881_v38  ;;  %v2426_v38 = vmul.f32 %v2394_v45, %v3963_v39  ;;  %v2488_v36 = vadd.f32 %v2456_v14, %v2424_v6  ;;  %v2396_v43 = vld [vmem:[%s4179_s19 + $0x48] sm:$0xff]  ;;  %v2462_v39 = vld [vmem:[%s4196_s11 + $0x58] sm:$0xff]  ;;  %p3419_p12 = scmp.ne.s32.totalorder %s4505_s26, %s3418_s24 }
 0x1a8   : > { %2530 = vperm.xlu1 %3231, %v2485_v58   ;;  %v2428_v37 = vmul.f32 %v2396_v43, %v3981_v59  ;;  %v2398_v58 = vld [vmem:[%s4179_s19 + $0x58] sm:$0xff]  ;;  %v2464_v6 = vld [vmem:[%s4196_s11 + $0x68] sm:$0xff] }
 0x1a9   : > { %v1882_v44 = vmul.f32 %v1849_v42, %v1460_v30  ;;  %v1977_v48 = vmul.f32 %v4226_v12, %v4226_v12  ;;  %v2490_v47 = vadd.f32 %v2458_v10, %v2426_v38  ;;  %v2430_v30 = vmul.f32 %v2398_v58, %v3997_v13  ;;  %v2400_v42 = vld [vmem:[%s4179_s19 + $0x68] sm:$0xff]  ;;  %p3420_p13 = pnand %p3419_p12, %p3592_p4 }
 0x1aa   : > { %v2492_v8 = vadd.f32 %v2460_v15, %v2428_v37  ;;  %v2388_v59 = vld [vmem:[%s4179_s19 + $0x8] sm:$0xff]  ;;  %v2406_v15 = vld [vmem:[%s4179_s19 + $0x98] sm:$0xff] }
 0x1ab   : > { %2039 = vadd.xlane.f32.xlu0 %v1977_v48  ;;  %v4234_v61 = vadd.f32 %v1914_v28, %v1882_v44  ;;  %v2432_v28 = vmul.f32 %v2400_v42, %v4011_v32  ;;  %v2494_v44 = vadd.f32 %v2462_v39, %v2430_v30  ;;  %v2402_v48 = vld [vmem:[%s4179_s19 + $0x78] sm:$0xff]  ;;  %v2404_v38 = vld [vmem:[%s4179_s19 + $0x88] sm:$0xff]  ;;  %v2391_v32 = vld [vmem:[%s4179_s19 + $0x20] sm:$0xff]  ;;  %p3421_p0 = pneg %p3420_p13 }
 0x1ac   : > { %2535 = vperm.xlu1 %3231, %v2486_v34   ;;  %v2434_v13 = vmul.f32 %v2402_v48, %v4027_v56  ;;  %v2452_v10 = vld [vmem:[%s4196_s11 + $0x8] sm:$0xff]  ;;  %v2423_v56 = vmul.f32 %v2391_v32, %v3942_v60  ;;  %v2455_v39 = vld [vmem:[%s4196_s11 + $0x20] sm:$0xff] }
 0x1ad   : > { %v1978_v54 = vmul.f32 %v4234_v61, %v4234_v61  ;;  %v2496_v14 = vadd.f32 %v2464_v6, %v2432_v28  ;;  %v2468_v30 = vld [vmem:[%s4196_s11 + $0x88] sm:$0xff] }
 0x1ae   : > { %v2408_v60 = vld [vmem:[%s4179_s19 + $0xa8] sm:$0xff]  ;;  %v2487_v6 = vadd.f32 %v2455_v39, %v2423_v56  ;;  %v2399_v39 = vld [vmem:[%s4179_s19 + $0x60] sm:$0xff] }
 0x1af   : > { %2041 = vadd.xlane.f32.xlu0 %v1978_v54  ;;  %v2420_v54 = vmul.f32 %v2388_v59, %v3921_v23  ;;  %v2470_v59 = vld [vmem:[%s4196_s11 + $0x98] sm:$0xff]  ;;  %v2472_v32 = vld [vmem:[%s4196_s11 + $0xa8] sm:$0xff] }
 0x1b0   : > { %2545 = vperm.xlu1 %3231, %v2488_v36   ;;  %v2466_v36 = vld [vmem:[%s4196_s11 + $0x78] sm:$0xff] }
 0x1b1   : > { %v2498_v58 = vadd.f32 %v2466_v36, %v2434_v13  ;;  %v2484_v23 = vadd.f32 %v2452_v10, %v2420_v54  ;;  %v2457_v13 = vld [vmem:[%s4196_s11 + $0x30] sm:$0xff]  ;;  %v2440_v54 = vmul.f32 %v2408_v60, %v4111_v57  ;;  %v2431_v60 = vmul.f32 %v2399_v39, %v4003_v21 }
 0x1b2   : > { %v2397_v10 = vld [vmem:[%s4179_s19 + $0x50] sm:$0xff]  ;;  %v1452_v21 = vadd.f32 %v4209_v26, %v4207_v2 }
 0x1b4   : > { %2555 = vperm.xlu1 %3231, %v2490_v47   ;;  %v2436_v47 = vmul.f32 %v2404_v38, %v4049_v9 }
 0x1b6   : > { %v2500_v9 = vadd.f32 %v2468_v30, %v2436_v47  ;;  %v2459_v47 = vld [vmem:[%s4196_s11 + $0x40] sm:$0xff] }
 0x1b8   : > { %2565 = vperm.xlu1 %3231, %v2492_v8   ;;  %v2393_v8 = vld [vmem:[%s4179_s19 + $0x30] sm:$0xff] }
 0x1b9   : > { %v2425_v48 = vmul.f32 %v2393_v8, %v3956_v25  ;;  %v2410_v25 = vld [vmem:[%s4179_s19 + $0xb8] sm:$0xff] }
 0x1ba   : > { %v2442_v56 = vmul.f32 %v2410_v25, %v4140_v22  ;;  %v2474_v8 = vld [vmem:[%s4196_s11 + $0xb8] sm:$0xff]  ;;  %v1442_v22 = vadd.f32 %v4183_v33, %v4181_v49  ;;  %v1461_v25 = vpop.f32.mrf.mxu1 }
 0x1bb   : > { %v2489_v36 = vadd.f32 %v2457_v13, %v2425_v48  ;;  %v2401_v13 = vld [vmem:[%s4179_s19 + $0x70] sm:$0xff] }
 0x1bc   : > { %v1980_v34 = vpop.xlane.xlu0 %1979  ;;  %2575 = vperm.xlu1 %3231, %v2494_v44   ;;  %v2438_v44 = vmul.f32 %v2406_v15, %v4080_v0  ;;  %v2429_v15 = vmul.f32 %v2397_v10, %v3989_v5  ;;  %v2506_v48 = vadd.f32 %v2474_v8, %v2442_v56  ;;  %v2405_v8 = vld [vmem:[%s4179_s19 + $0x90] sm:$0xff] }
 0x1bd   : > { %v2043_v45 = vmax.f32 %v1980_v34, 1e-24  ;;  %v2395_v34 = vld [vmem:[%s4179_s19 + $0x40] sm:$0xff] }
 0x1be   : > { %v2502_v0 = vadd.f32 %v2470_v59, %v2438_v44  ;;  %v2427_v38 = vmul.f32 %v2395_v34, %v3973_v50  ;;  %v2504_v50 = vadd.f32 %v2472_v32, %v2440_v54  ;;  %v2461_v44 = vld [vmem:[%s4196_s11 + $0x50] sm:$0xff]  ;;  %v2476_v34 = vld [vmem:[%s4196_s11 + $0xc8] sm:$0xff] }
 0x1bf   : > { %3328 = vrsqrt.f32 %v2043_v45  ;;  %v2493_v59 = vadd.f32 %v2461_v44, %v2429_v15 }
 0x1c0   : > { %v1982_v43 = vpop.xlane.xlu0 %1981  ;;  %2585 = vperm.xlu1 %3231, %v2496_v14   ;;  %v2491_v30 = vadd.f32 %v2459_v47, %v2427_v38  ;;  %v2416_v38 = vld [vmem:[%s4179_s19 + $0xe8] sm:$0xff]  ;;  %v2465_v47 = vld [vmem:[%s4196_s11 + $0x70] sm:$0xff] }
 0x1c1   : > { %v2044_v37 = vmax.f32 %v1982_v43, 1e-24  ;;  %v2448_v26 = vmul.f32 %v2416_v38, %v1452_v21  ;;  %v2415_v38 = vld [vmem:[%s4179_s19 + $0xe0] sm:$0xff] }
 0x1c3   : > { %3330 = vrsqrt.f32 %v2044_v37 }
 0x1c4   : > { %v1984_v42 = vpop.xlane.xlu1 %1983  ;;  %2595 = vperm.xlu1 %3231, %v2498_v58  }
 0x1c5   : > { %v2045_v28 = vmax.f32 %v1984_v42, 1e-24  ;;  %2525 = vperm.xlu0 %3230, %v2484_v23   ;;  %v2412_v23 = vld [vmem:[%s4179_s19 + $0xc8] sm:$0xff] }
 0x1c6   : > { %v2444_v5 = vmul.f32 %v2412_v23, %v4160_v55  ;;  %v2480_v23 = vld [vmem:[%s4196_s11 + $0xe8] sm:$0xff] }
 0x1c7   : > { %3332 = vrsqrt.f32 %v2045_v28 }
 0x1c8   : > { %v1986_v45 = vpop.xlane.xlu1 %1985  ;;  %2605 = vperm.xlu1 %3231, %v2500_v9   ;;  %v2508_v54 = vadd.f32 %v2476_v34, %v2444_v5  ;;  %v2407_v5 = vld [vmem:[%s4179_s19 + $0xa0] sm:$0xff] }
 0x1c9   : > { %v2046_v14 = vmax.f32 %v1986_v45, 1e-24  ;;  %2540 = vperm.xlu0 %3230, %v2487_v6   ;;  %v2414_v6 = vld [vmem:[%s4179_s19 + $0xd8] sm:$0xff]  ;;  %v2471_v34 = vld [vmem:[%s4196_s11 + $0xa0] sm:$0xff] }
 0x1ca   : > { %v2446_v33 = vmul.f32 %v2414_v6, %v1442_v22  ;;  %v2469_v22 = vld [vmem:[%s4196_s11 + $0x90] sm:$0xff] }
 0x1cb   : > { %3334 = vrsqrt.f32 %v2046_v14 }
 0x1cc   : > { %v3329_v43 = vpop.eup %3328  ;;  %v1988_v37 = vpop.xlane.xlu1 %1987  ;;  %2615 = vperm.xlu1 %3231, %v2502_v0   ;;  %v2433_v0 = vmul.f32 %v2401_v13, %v4019_v41 }
 0x1cd   : > { %v2047_v58 = vmax.f32 %v1988_v37, 1e-24  ;;  %2550 = vperm.xlu0 %3230, %v2489_v36   ;;  %v2107_v57 = vmul.f32 %v3329_v43, %v3918_v17  ;;  %v1268_v36 = vpop.f32.mrf.mxu0  ;;  %v2478_v43 = vld [vmem:[%s4196_s11 + $0xd8] sm:$0xff]  ;;  %v2403_v37 = vld [vmem:[%s4179_s19 + $0x80] sm:$0xff] }
 0x1ce   : > { %v2435_v56 = vmul.f32 %v2403_v37, %v4036_v29  ;;  %v2497_v15 = vadd.f32 %v2465_v47, %v2433_v0  ;;  %v2437_v29 = vmul.f32 %v2405_v8, %v4064_v19  ;;  %v2409_v19 = vld [vmem:[%s4179_s19 + $0xb0] sm:$0xff] }
 0x1cf   : > { %3336 = vrsqrt.f32 %v2047_v58  ;;  %3079 = vmatprep.mubr.f32.mxu0 %v2107_v57  ;;  %v1462_v58 = vadd.f32 %v1461_v25, %v1268_v36  ;;  %v2510_v57 = vadd.f32 %v2478_v43, %v2446_v33  ;;  %v2441_v13 = vmul.f32 %v2409_v19, %v4128_v3  ;;  %v2477_v25 = vld [vmem:[%s4196_s11 + $0xd0] sm:$0xff] }
 0x1d0   : > { %v3331_v42 = vpop.eup %3330  ;;  %v1990_v28 = vpop.xlane.xlu1 %1989  ;;  %2625 = vperm.xlu1 %3231, %v2504_v50   ;;  %v2418_v50 = vld [vmem:[%s4179_s19 + $0xf8] sm:$0xff]  ;;  %v2501_v6 = vadd.f32 %v2469_v22, %v2437_v29  ;;  %v2447_v36 = vmul.f32 %v2415_v38, %v4198_v46  ;;  %v2417_v43 = vld [vmem:[%s4179_s19 + $0xf0] sm:$0xff] }
 0x1d1   : > { %v2048_v9 = vmax.f32 %v1990_v28, 1e-24  ;;  %2560 = vperm.xlu0 %3230, %v2491_v30   ;;  %v2108_v17 = vmul.f32 %v3331_v42, %v3925_v27  ;;  %v2463_v27 = vld [vmem:[%s4196_s11 + $0x60] sm:$0xff]  ;;  %v2450_v39 = vmul.f32 %v2418_v50, %v1462_v58  ;;  %v2512_v28 = vadd.f32 %v2480_v23, %v2448_v26 }
 0x1d2   : > { %v2495_v32 = vadd.f32 %v2463_v27, %v2431_v60  ;;  %v2467_v42 = vld [vmem:[%s4196_s11 + $0x80] sm:$0xff] }
 0x1d3   : > { %3338 = vrsqrt.f32 %v2048_v9  ;;  %3080 = vmatmul.mubr.f32.vlgmr.msra.gmra.mxu0 %v2108_v17  ;;  %v2499_v44 = vadd.f32 %v2467_v42, %v2435_v56  ;;  %v2482_v9 = vld [vmem:[%s4196_s11 + $0xf8] sm:$0xff]  ;;  %v2411_v27 = vld [vmem:[%s4179_s19 + $0xc0] sm:$0xff] }
 0x1d4   : > { %v3333_v45 = vpop.eup %3332  ;;  %v1992_v14 = vpop.xlane.xlu1 %1991  ;;  %2635 = vperm.xlu1 %3231, %v2506_v48   ;;  %v2514_v60 = vadd.f32 %v2482_v9, %v2450_v39  ;;  %v2443_v33 = vmul.f32 %v2411_v27, %v4153_v35  ;;  %v2449_v35 = vmul.f32 %v2417_v43, %v4220_v51  ;;  %v4608_v43 = vld [vmem:[#allocation12_spill] sm:$0xff] }
 0x1d5   : > { %v2049_v55 = vmax.f32 %v1992_v14, 1e-24  ;;  %2570 = vperm.xlu0 %3230, %v2493_v59   ;;  %v2109_v49 = vmul.f32 %v3333_v45, %v3932_v40 }
 0x1d7   : > { %3340 = vrsqrt.f32 %v2049_v55  ;;  %3082 = vmatprep.mubr.f32.mxu0 %v2109_v49  ;;  %v4605_v55 = vld [vmem:[#allocation9_spill] sm:$0xff] }
 0x1d8   : > { %v3335_v10 = vpop.eup %3334  ;;  %v1994_v40 = vpop.xlane.xlu1 %1993  ;;  %2645 = vperm.xlu1 %3231, %v2508_v54   ;;  %v2475_v54 = vld [vmem:[%s4196_s11 + $0xc0] sm:$0xff] }
 0x1d9   : > { %v2050_v2 = vmax.f32 %v1994_v40, 1e-24  ;;  %2580 = vperm.xlu0 %3230, %v2495_v32   ;;  %v2110_v41 = vmul.f32 %v3335_v10, %v3939_v53  ;;  %v2507_v0 = vadd.f32 %v2475_v54, %v2443_v33  ;;  %v2479_v10 = vld [vmem:[%s4196_s11 + $0xe0] sm:$0xff]  ;;  %v2481_v40 = vld [vmem:[%s4196_s11 + $0xf0] sm:$0xff] }
 0x1da   : > { %v2511_v37 = vadd.f32 %v2479_v10, %v2447_v36  ;;  %v2513_v47 = vadd.f32 %v2481_v40, %v2449_v35 }
 0x1db   : > { %3342 = vrsqrt.f32 %v2050_v2  ;;  %3083 = vmatmul.mubr.f32.gmra.mxu0 %v2110_v41 }
 0x1dc   : > { %v3337_v30 = vpop.eup %3336  ;;  %2655 = vperm.xlu1 %3231, %v2510_v57  }
 0x1dd   : > { %2590 = vperm.xlu0 %3230, %v2497_v15   ;;  %v2111_v53 = vmul.f32 %v3337_v30, %v3946_v1  ;;  %v2439_v1 = vmul.f32 %v2407_v5, %v4098_v20  ;;  %v2473_v20 = vld [vmem:[%s4196_s11 + $0xb0] sm:$0xff]  ;;  %s3422_s11 = sshll.u32 %s3504_s20, 4  ;;  %s3423_s11 = int_to_ptr.vmem [resolvable:$false] %s3422_s11 }
 0x1de   : > { %v2505_v21 = vadd.f32 %v2473_v20, %v2441_v13  ;;  %s3424_s12 = scalar_lea.vmem %s3423_s11, 8192  ;;  %p3425_p1 = scmp.lt.s32.totalorder %s4505_s26, %s3423_s11 }
 0x1df   : > { %3085 = vmatprep.mubr.f32.mxu0 %v2111_v53  ;;  %p3426_p2 = scmp.lt.s32.totalorder %s3424_s12, %s3418_s24 }
 0x1e0   : > { %v3339_v17 = vpop.eup %3338  ;;  %2665 = vperm.xlu1 %3231, %v2512_v28  }
 0x1e1   : > { %2600 = vperm.xlu0 %3230, %v2499_v44   ;;  %v2112_v48 = vmul.f32 %v3339_v17, %v3953_v16  ;;  %v2503_v16 = vadd.f32 %v2471_v34, %v2439_v1  ;;  %p3427_p3 = por %p3426_p2, %p3425_p1 }
 0x1e3   : > { %3086 = vmatmul.mubr.f32.gmra.mxu0 %v2112_v48  ;;  %p3428_p5 = pnand %p3427_p3, %p3421_p0 }
 0x1e4   : > { %v3341_v59 = vpop.eup %3340  ;;  %2675 = vperm.xlu1 %3231, %v2514_v60  }
 0x1e5   : > { %2610 = vperm.xlu0 %3230, %v2501_v6   ;;  %v2113_v45 = vmul.f32 %v3341_v59, %v3960_v31  ;;  %v2413_v31 = vld [vmem:[%s4179_s19 + $0xd0] sm:$0xff]  ;;  %s4503_s19 = scalar_lea.hbm %s4566_s8, %s2998_s16 }
 0x1e6   : > { %v2445_v3 = vmul.f32 %v2413_v31, %v4169_v24  ;;  %v4607_v31 = vld [vmem:[#allocation11_spill] sm:$0xff] }
 0x1e7   : > { %3088 = vmatprep.mubr.f32.mxu0 %v2113_v45 }
 0x1e8   : > { %v3343_v14 = vpop.eup %3342  ;;  %v2509_v32 = vadd.f32 %v2477_v25, %v2445_v3 }
 0x1e9   : > { %2620 = vperm.xlu0 %3230, %v2503_v16   ;;  %v2114_v49 = vmul.f32 %v3343_v14, %v4605_v55  ;;  %v4606_v14 = vld [vmem:[#allocation10_spill] sm:$0xff] }
 0x1eb   : > { %3089 = vmatmul.mubr.f32.gmra.mxu0 %v2114_v49 }
 0x1ed   : > { %2630 = vperm.xlu0 %3230, %v2505_v21  }
 0x1f1   : > { %2640 = vperm.xlu0 %3230, %v2507_v0  }
 0x1f5   : > { %2650 = vperm.xlu0 %3230, %v2509_v32  }
 0x1f9   : > { %2660 = vperm.xlu0 %3230, %v2511_v37  }
 0x1fc   : > { %v2012_v2 = vpop.xlane.xlu1 %2011 }
 0x1fd   : > { %v2059_v41 = vmax.f32 %v2012_v2, 1e-24  ;;  %2670 = vperm.xlu0 %3230, %v2513_v47   ;;  %v4609_v47 = vld [vmem:[#allocation13_spill] sm:$0xff] }
 0x1ff   : > { %3344 = vrsqrt.f32 %v2059_v41  ;;  %v4610_v41 = vld [vmem:[#allocation14_spill] sm:$0xff] }
 0x200   : > { %v1996_v24 = vpop.xlane.xlu1 %1995  ;;  %v2014_v26 = vpop.xlane.xlu0 %2013 }
 0x201   : > { %v2051_v58 = vmax.f32 %v1996_v24, 1e-24  ;;  %v2060_v57 = vmax.f32 %v2014_v26, 1e-24 }
 0x203   : > { %3346 = vrsqrt.f32 %v2051_v58 }
 0x204   : > { %3348 = vrsqrt.f32 %v2060_v57  ;;  %v1998_v46 = vpop.xlane.xlu1 %1997  ;;  %v2016_v56 = vpop.xlane.xlu0 %2015 }
 0x205   : > { %v2052_v50 = vmax.f32 %v1998_v46, 1e-24  ;;  %v2061_v15 = vmax.f32 %v2016_v56, 1e-24  ;;  %v4611_v46 = vld [vmem:[#allocation15_spill] sm:$0xff] }
 0x207   : > { %3350 = vrsqrt.f32 %v2052_v50  ;;  %v4612_v50 = vld [vmem:[#allocation16_spill] sm:$0xff] }
 0x208   : > { %3352 = vrsqrt.f32 %v2061_v15  ;;  %v2000_v51 = vpop.xlane.xlu1 %1999  ;;  %v2018_v23 = vpop.xlane.xlu0 %2017 }
 0x209   : > { %v2053_v30 = vmax.f32 %v2000_v51, 1e-24  ;;  %v2062_v8 = vmax.f32 %v2018_v23, 1e-24 }
 0x20b   : > { %3354 = vrsqrt.f32 %v2053_v30 }
 0x20c   : > { %v3345_v42 = vpop.eup %3344  ;;  %3356 = vrsqrt.f32 %v2062_v8  ;;  %v2002_v53 = vpop.xlane.xlu1 %2001 }
 0x20d   : > { %v2020_v39 = vpop.xlane.xlu0 %2019  ;;  %v2054_v28 = vmax.f32 %v2002_v53, 1e-24  ;;  %v2123_v44 = vmul.f32 %v3345_v42, %v4038_v52  ;;  %v4613_v42 = vld [vmem:[#allocation17_spill] sm:$0xff] }
 0x20e   : > { %v2063_v29 = vmax.f32 %v2020_v39, 1e-24  ;;  %v4614_v39 = vld [vmem:[#allocation18_spill] sm:$0xff] }
 0x20f   : > { %3358 = vrsqrt.f32 %v2054_v28  ;;  %3103 = vmatprep.mubr.f32.mxu1 %v2123_v44 }
 0x210   : > { %v3347_v9 = vpop.eup %3346  ;;  %3360 = vrsqrt.f32 %v2063_v29  ;;  %v2004_v17 = vpop.xlane.xlu1 %2003 }
 0x211   : > { %v2022_v5 = vpop.xlane.xlu0 %2021  ;;  %v3349_v22 = vpop.eup %3348  ;;  %v2055_v48 = vmax.f32 %v2004_v17, 1e-24  ;;  %v2115_v1 = vmul.f32 %v3347_v9, %v4040_v18 }
 0x212   : > { %v2064_v60 = vmax.f32 %v2022_v5, 1e-24  ;;  %v2124_v6 = vmul.f32 %v3349_v22, %v4053_v62  ;;  %v4615_v5 = vld [vmem:[#allocation19_spill] sm:$0xff] }
 0x213   : > { %3362 = vrsqrt.f32 %v2055_v48  ;;  %3091 = vmatprep.mubr.f32.mxu0 %v2115_v1  ;;  %v4616_v48 = vld [vmem:[#allocation20_spill] sm:$0xff] }
 0x214   : > { %v3351_v59 = vpop.eup %3350  ;;  %3364 = vrsqrt.f32 %v2064_v60  ;;  %3104 = vmatmul.mubr.f32.vlgmr.msra.gmra.mxu1 %v2124_v6  ;;  %v2006_v19 = vpop.xlane.xlu1 %2005 }
 0x215   : > { %v2024_v52 = vpop.xlane.xlu0 %2023  ;;  %v3353_v34 = vpop.eup %3352  ;;  %v2056_v45 = vmax.f32 %v2006_v19, 1e-24  ;;  %v2116_v16 = vmul.f32 %v3351_v59, %v4055_v63  ;;  %v4617_v19 = vld [vmem:[#allocation21_spill] sm:$0xff] }
 0x216   : > { %v2065_v13 = vmax.f32 %v2024_v52, 1e-24  ;;  %v2125_v27 = vmul.f32 %v3353_v34, %v4606_v14 }
 0x217   : > { %3366 = vrsqrt.f32 %v2056_v45  ;;  %3092 = vmatmul.mubr.f32.gmra.mxu0 %v2116_v16  ;;  %v4618_v16 = vld [vmem:[#allocation22_spill] sm:$0xff] }
 0x218   : > { %v3355_v20 = vpop.eup %3354  ;;  %3368 = vrsqrt.f32 %v2065_v13  ;;  %3106 = vmatprep.mubr.f32.mxu1 %v2125_v27  ;;  %v2008_v18 = vpop.xlane.xlu1 %2007 }
 0x219   : > { %v2026_v62 = vpop.xlane.xlu0 %2025  ;;  %v3357_v55 = vpop.eup %3356  ;;  %v2057_v49 = vmax.f32 %v2008_v18, 1e-24  ;;  %v2117_v21 = vmul.f32 %v3355_v20, %v4072_v4 }
 0x21a   : > { %v2066_v33 = vmax.f32 %v2026_v62, 1e-24  ;;  %v2126_v54 = vmul.f32 %v3357_v55, %v4607_v31  ;;  %v4619_v62 = vld [vmem:[#allocation23_spill] sm:$0xff] }
 0x21b   : > { %3370 = vrsqrt.f32 %v2057_v49  ;;  %3094 = vmatprep.mubr.f32.mxu0 %v2117_v21 }
 0x21c   : > { %v3359_v3 = vpop.eup %3358  ;;  %3372 = vrsqrt.f32 %v2066_v33  ;;  %3107 = vmatmul.mubr.f32.gmra.mxu1 %v2126_v54  ;;  %v2010_v63 = vpop.xlane.xlu1 %2009  ;;  %v4620_v33 = vld [vmem:[#allocation24_spill] sm:$0xff] }
 0x21d   : > { %v2028_v0 = vpop.xlane.xlu0 %2027  ;;  %v3361_v38 = vpop.eup %3360  ;;  %v2058_v25 = vmax.f32 %v2010_v63, 1e-24  ;;  %v2118_v32 = vmul.f32 %v3359_v3, %v4094_v11 }
 0x21e   : > { %v2067_v36 = vmax.f32 %v2028_v0, 1e-24  ;;  %v2127_v10 = vmul.f32 %v3361_v38, %v4608_v43 }
 0x21f   : > { %3374 = vrsqrt.f32 %v2058_v25  ;;  %3095 = vmatmul.mubr.f32.gmra.mxu0 %v2118_v32  ;;  %v2515_v25 = vlaneseq }
 0x220   : > { %v3363_v35 = vpop.eup %3362  ;;  %3376 = vrsqrt.f32 %v2067_v36  ;;  %3109 = vmatprep.mubr.f32.mxu1 %v2127_v10  ;;  %v2521_v32 = vpop.permute.xlu1 %2520 }
 0x221   : > { %v2030_v4 = vpop.xlane.xlu0 %2029  ;;  %v3365_v37 = vpop.eup %3364  ;;  %v2119_v2 = vmul.f32 %v3363_v35, %v4609_v47  ;;  %v4356_v36 = vand.u32 127, %v2515_v25 }
 0x222   : > { %v2068_v40 = vmax.f32 %v2030_v4, 1e-24  ;;  %v2128_v24 = vmul.f32 %v3365_v37, %v4610_v41 }
 0x223   : > { %3097 = vmatprep.mubr.f32.mxu0 %v2119_v2  ;;  %vm2517_vm0 = vcmp.eq.s32.totalorder %v4356_v36, 5 }
 0x224   : > { %3378 = vrsqrt.f32 %v2068_v40  ;;  %v3367_v26 = vpop.eup %3366  ;;  %3110 = vmatmul.mubr.f32.gmra.mxu1 %v2128_v24  ;;  %v2531_v37 = vpop.permute.xlu1 %2530 }
 0x225   : > { %v2032_v58 = vpop.xlane.xlu0 %2031  ;;  %v3369_v11 = vpop.eup %3368  ;;  %v2120_v56 = vmul.f32 %v3367_v26, %v4611_v46 }
 0x226   : > { %v2069_v57 = vmax.f32 %v2032_v58, 1e-24  ;;  %v2129_v15 = vmul.f32 %v3369_v11, %v4612_v50 }
 0x227   : > { %3098 = vmatmul.mubr.f32.gmra.mxu0 %v2120_v56 }
 0x228   : > { %3380 = vrsqrt.f32 %v2069_v57  ;;  %v3371_v51 = vpop.eup %3370  ;;  %3112 = vmatprep.mubr.f32.mxu1 %v2129_v15  ;;  %v2536_v41 = vpop.permute.xlu1 %2535 }
 0x229   : > { %v2034_v23 = vpop.xlane.xlu0 %2033  ;;  %v3373_v30 = vpop.eup %3372  ;;  %v2121_v53 = vmul.f32 %v3371_v51, %v4613_v42 }
 0x22a   : > { %v2070_v8 = vmax.f32 %v2034_v23, 1e-24  ;;  %v2130_v28 = vmul.f32 %v3373_v30, %v4614_v39 }
 0x22b   : > { %3100 = vmatprep.mubr.f32.mxu0 %v2121_v53 }
 0x22c   : > { %3382 = vrsqrt.f32 %v2070_v8  ;;  %v3375_v29 = vpop.eup %3374  ;;  %3113 = vmatmul.mubr.f32.gmra.mxu1 %v2130_v28  ;;  %v2546_v56 = vpop.permute.xlu1 %2545 }
 0x22d   : > { %v2036_v44 = vpop.xlane.xlu0 %2035  ;;  %v3377_v9 = vpop.eup %3376  ;;  %v2122_v22 = vmul.f32 %v3375_v29, %v4615_v5 }
 0x22e   : > { %v2071_v17 = vmax.f32 %v2036_v44, 1e-24  ;;  %v2131_v60 = vmul.f32 %v3377_v9, %v4616_v48 }
 0x22f   : > { %3101 = vmatmul.mubr.f32.gmra.mxu0 %v2122_v22 }
 0x230   : > { %3384 = vrsqrt.f32 %v2071_v17  ;;  %3115 = vmatprep.mubr.f32.mxu1 %v2131_v60  ;;  %v2556_v53 = vpop.permute.xlu1 %2555 }
 0x231   : > { %v3379_v1 = vpop.eup %3378  ;;  %v2038_v6 = vpop.xlane.xlu0 %2037 }
 0x232   : > { %v2072_v59 = vmax.f32 %v2038_v6, 1e-24  ;;  %v2132_v52 = vmul.f32 %v3379_v1, %v4617_v19 }
 0x234   : > { %3386 = vrsqrt.f32 %v2072_v59  ;;  %3116 = vmatmul.mubr.f32.gmra.mxu1 %v2132_v52  ;;  %v2566_v17 = vpop.permute.xlu1 %2565 }
 0x235   : > { %v3381_v34 = vpop.eup %3380  ;;  %v2040_v45 = vpop.xlane.xlu0 %2039 }
 0x236   : > { %v2073_v13 = vmax.f32 %v2040_v45, 1e-24  ;;  %v2133_v14 = vmul.f32 %v3381_v34, %v4618_v16 }
 0x238   : > { %3388 = vrsqrt.f32 %v2073_v13  ;;  %3118 = vmatprep.mubr.f32.mxu1 %v2133_v14  ;;  %v2576_v22 = vpop.permute.xlu1 %2575 }
 0x239   : > { %v3383_v27 = vpop.eup %3382  ;;  %v2042_v20 = vpop.xlane.xlu0 %2041 }
 0x23a   : > { %v2074_v18 = vmax.f32 %v2042_v20, 1e-24  ;;  %v2134_v55 = vmul.f32 %v3383_v27, %v4619_v62 }
 0x23c   : > { %3390 = vrsqrt.f32 %v2074_v18  ;;  %3119 = vmatmul.mubr.f32.gmra.mxu1 %v2134_v55  ;;  %v2586_v60 = vpop.permute.xlu1 %2585 }
 0x23d   : > { %v3385_v49 = vpop.eup %3384 }
 0x23e   : > { %v2135_v21 = vmul.f32 %v3385_v49, %v4620_v33 }
 0x240   : > { %3121 = vmatprep.mubr.f32.mxu1 %v2135_v21  ;;  %v2526_v10 = vpop.permute.xlu0 %2525  ;;  %v4400_v6 = vpop.permute.xlu1 %2595 }
 0x241   : > { %v3387_v31 = vpop.eup %3386 }
 0x242   : > { %v2136_v54 = vmul.f32 %v3387_v31, %v4216_v7  ;;  %v4363_v7 = vld [vmem:[%s4565_s7] ss:$0 sm:$0xff] }
 0x244   : > { %3122 = vmatmul.mubr.f32.gmra.mxu1 %v2136_v54  ;;  %v2541_v23 = vpop.permute.xlu0 %2540  ;;  %v2606_v34 = vpop.permute.xlu1 %2605 }
 0x245   : > { %v3389_v3 = vpop.eup %3388 }
 0x246   : > { %v2137_v63 = vmul.f32 %v3389_v3, %v4226_v12 }
 0x248   : > { %3124 = vmatprep.mubr.f32.mxu1 %v2137_v63  ;;  %v2551_v44 = vpop.permute.xlu0 %2550  ;;  %v2616_v54 = vpop.permute.xlu1 %2615 }
 0x249   : > { %v3391_v0 = vpop.eup %3390 }
 0x24a   : > { %v2138_v38 = vmul.f32 %v3391_v0, %v4234_v61 }
 0x24c   : > { %3125 = vmatmul.mubr.f32.gmra.mxu1 %v2138_v38  ;;  %v2561_v5 = vpop.permute.xlu0 %2560 }
 0x250   : > { %v2571_v48 = vpop.permute.xlu0 %2570 }
 0x254   : > { %v2581_v1 = vpop.permute.xlu0 %2580 }
 0x258   : > { %v4402_v59 = vpop.permute.xlu0 %2590 }
 0x25c   : > { %v2601_v27 = vpop.permute.xlu0 %2600 }
 0x260   : > { %v2611_v25 = vpop.permute.xlu0 %2610 }
 0x293   : > { %v3081_v43 = vpop.f32.mrf.mxu0 }
 0x294   : > { %v2234_v12 = vadd.f32 %v3081_v43, %v4363_v7 }
 0x295   : > { %v2228_v61 = vpop.f32.mrf.mxu0 }
 0x296   : > { %v2679_v35 = vsel %vm2517_vm0, %v2526_v10, %v2234_v12  ;;  %v2229_v4 = vadd.f32 %v4363_v7, %v2228_v61 }
 0x297   : > { %2711 = vst [vmem:[%s4370_s21 + $0x8] sm:$0xff] %v2679_v35 }
 0x298   : > { %v2678_v40 = vsel %vm2517_vm0, %v2521_v32, %v2229_v4 }
 0x299   : > { %2710 = vst [vmem:[%s4370_s21] sm:$0xff] %v2678_v40  ;;  %v2626_v40 = vpop.permute.xlu1 %2625 }
 0x29b   : > { %v3084_v47 = vpop.f32.mrf.mxu0 }
 0x29c   : > { %v2244_v2 = vadd.f32 %v3084_v47, %v4363_v7 }
 0x29d   : > { %v2238_v24 = vpop.f32.mrf.mxu0 }
 0x29e   : > { %v2681_v26 = vsel %vm2517_vm0, %v2536_v41, %v2244_v2  ;;  %v2239_v58 = vadd.f32 %v4363_v7, %v2238_v24 }
 0x29f   : > { %2713 = vst [vmem:[%s4370_s21 + $0x18] sm:$0xff] %v2681_v26  ;;  %v2621_v26 = vpop.permute.xlu0 %2620 }
 0x2a0   : > { %v2680_v11 = vsel %vm2517_vm0, %v2531_v37, %v2239_v58 }
 0x2a1   : > { %2712 = vst [vmem:[%s4370_s21 + $0x10] sm:$0xff] %v2680_v11 }
 0x2a3   : > { %v3087_v57 = vpop.f32.mrf.mxu0 }
 0x2a4   : > { %v2254_v46 = vadd.f32 %v3087_v57, %v4363_v7 }
 0x2a5   : > { %v2248_v50 = vpop.f32.mrf.mxu0 }
 0x2a6   : > { %v2683_v15 = vsel %vm2517_vm0, %v2546_v56, %v2254_v46  ;;  %v2249_v51 = vadd.f32 %v4363_v7, %v2248_v50 }
 0x2a7   : > { %2715 = vst [vmem:[%s4370_s21 + $0x28] sm:$0xff] %v2683_v15 }
 0x2a8   : > { %v2682_v30 = vsel %vm2517_vm0, %v2541_v23, %v2249_v51  ;;  %v2636_v23 = vpop.permute.xlu1 %2635 }
 0x2a9   : > { %2714 = vst [vmem:[%s4370_s21 + $0x20] sm:$0xff] %v2682_v30 }
 0x2ab   : > { %v3090_v8 = vpop.f32.mrf.mxu0 }
 0x2ac   : > { %v2264_v42 = vadd.f32 %v3090_v8, %v4363_v7 }
 0x2ad   : > { %v2258_v39 = vpop.f32.mrf.mxu0 }
 0x2ae   : > { %v2685_v28 = vsel %vm2517_vm0, %v2556_v53, %v2264_v42  ;;  %v2259_v29 = vadd.f32 %v4363_v7, %v2258_v39  ;;  %v2631_v39 = vpop.permute.xlu0 %2630 }
 0x2af   : > { %2717 = vst [vmem:[%s4370_s21 + $0x38] sm:$0xff] %v2685_v28 }
 0x2b0   : > { %v2684_v9 = vsel %vm2517_vm0, %v2551_v44, %v2259_v29 }
 0x2b1   : > { %2716 = vst [vmem:[%s4370_s21 + $0x30] sm:$0xff] %v2684_v9 }
 0x2d4   : > { %v3105_v19 = vpop.f32.mrf.mxu1 }
 0x2d5   : > { %v2314_v52 = vadd.f32 %v3105_v19, %v4363_v7 }
 0x2d6   : > { %v2308_v45 = vpop.f32.mrf.mxu1 }
 0x2d7   : > { %v2695_v13 = vsel %vm2517_vm0, %v2606_v34, %v2314_v52  ;;  %v2309_v16 = vadd.f32 %v4363_v7, %v2308_v45  ;;  %v3093_v14 = vpop.f32.mrf.mxu0  ;;  %v2641_v52 = vpop.permute.xlu0 %2640 }
 0x2d8   : > { %2727 = vst [vmem:[%s4370_s21 + $0x88] sm:$0xff] %v2695_v13  ;;  %v2274_v20 = vadd.f32 %v3093_v14, %v4363_v7 }
 0x2d9   : > { %v2694_v18 = vsel %vm2517_vm0, %v2601_v27, %v2309_v16  ;;  %v2268_v62 = vpop.f32.mrf.mxu0 }
 0x2da   : > { %2726 = vst [vmem:[%s4370_s21 + $0x80] sm:$0xff] %v2694_v18  ;;  %v2687_v55 = vsel %vm2517_vm0, %v2566_v17, %v2274_v20  ;;  %v2269_v49 = vadd.f32 %v4363_v7, %v2268_v62 }
 0x2db   : > { %2719 = vst [vmem:[%s4370_s21 + $0x48] sm:$0xff] %v2687_v55  ;;  %v2651_v20 = vpop.permute.xlu0 %2650 }
 0x2dc   : > { %v2686_v33 = vsel %vm2517_vm0, %v2561_v5, %v2269_v49  ;;  %v3108_v21 = vpop.f32.mrf.mxu1 }
 0x2dd   : > { %2718 = vst [vmem:[%s4370_s21 + $0x40] sm:$0xff] %v2686_v33  ;;  %v2324_v31 = vadd.f32 %v3108_v21, %v4363_v7 }
 0x2de   : > { %v2318_v3 = vpop.f32.mrf.mxu1 }
 0x2df   : > { %v2697_v63 = vsel %vm2517_vm0, %v2616_v54, %v2324_v31  ;;  %v2319_v0 = vadd.f32 %v4363_v7, %v2318_v3  ;;  %v3096_v38 = vpop.f32.mrf.mxu0  ;;  %v2661_v54 = vpop.permute.xlu0 %2660 }
 0x2e0   : > { %2729 = vst [vmem:[%s4370_s21 + $0x98] sm:$0xff] %v2697_v63  ;;  %v2284_v32 = vadd.f32 %v3096_v38, %v4363_v7 }
 0x2e1   : > { %v2696_v43 = vsel %vm2517_vm0, %v2611_v25, %v2319_v0  ;;  %v2278_v12 = vpop.f32.mrf.mxu0 }
 0x2e2   : > { %2728 = vst [vmem:[%s4370_s21 + $0x90] sm:$0xff] %v2696_v43  ;;  %v2689_v10 = vsel %vm2517_vm0, %v2576_v22, %v2284_v32  ;;  %v2279_v61 = vadd.f32 %v4363_v7, %v2278_v12 }
 0x2e3   : > { %2721 = vst [vmem:[%s4370_s21 + $0x58] sm:$0xff] %v2689_v10  ;;  %v2671_v12 = vpop.permute.xlu0 %2670 }
 0x2e4   : > { %v2688_v35 = vsel %vm2517_vm0, %v2571_v48, %v2279_v61  ;;  %v3111_v4 = vpop.f32.mrf.mxu1 }
 0x2e5   : > { %2720 = vst [vmem:[%s4370_s21 + $0x50] sm:$0xff] %v2688_v35  ;;  %v2334_v37 = vadd.f32 %v3111_v4, %v4363_v7 }
 0x2e6   : > { %v2328_v47 = vpop.f32.mrf.mxu1 }
 0x2e7   : > { %v2699_v2 = vsel %vm2517_vm0, %v2626_v40, %v2334_v37  ;;  %v2329_v41 = vadd.f32 %v4363_v7, %v2328_v47  ;;  %v3099_v24 = vpop.f32.mrf.mxu0 }
 0x2e8   : > { %2731 = vst [vmem:[%s4370_s21 + $0xa8] sm:$0xff] %v2699_v2  ;;  %v2294_v58 = vadd.f32 %v3099_v24, %v4363_v7 }
 0x2e9   : > { %v2698_v11 = vsel %vm2517_vm0, %v2621_v26, %v2329_v41  ;;  %v2288_v57 = vpop.f32.mrf.mxu0 }
 0x2ea   : > { %2730 = vst [vmem:[%s4370_s21 + $0xa0] sm:$0xff] %v2698_v11  ;;  %v2691_v46 = vsel %vm2517_vm0, %v2586_v60, %v2294_v58  ;;  %v2289_v56 = vadd.f32 %v4363_v7, %v2288_v57  ;;  %v2646_v60 = vpop.permute.xlu1 %2645 }
 0x2eb   : > { %2723 = vst [vmem:[%s4370_s21 + $0x68] sm:$0xff] %v2691_v46 }
 0x2ec   : > { %v2690_v50 = vsel %vm2517_vm0, %v2581_v1, %v2289_v56  ;;  %v3114_v15 = vpop.f32.mrf.mxu1 }
 0x2ed   : > { %2722 = vst [vmem:[%s4370_s21 + $0x60] sm:$0xff] %v2690_v50  ;;  %v2344_v51 = vadd.f32 %v3114_v15, %v4363_v7 }
 0x2ee   : > { %v2338_v30 = vpop.f32.mrf.mxu1  ;;  %v2656_v13 = vpop.permute.xlu1 %2655 }
 0x2ef   : > { %v2701_v8 = vsel %vm2517_vm0, %v2636_v23, %v2344_v51  ;;  %v2339_v42 = vadd.f32 %v4363_v7, %v2338_v30  ;;  %v3102_v53 = vpop.f32.mrf.mxu0 }
 0x2f0   : > { %2733 = vst [vmem:[%s4370_s21 + $0xb8] sm:$0xff] %v2701_v8  ;;  %v2304_v28 = vadd.f32 %v3102_v53, %v4363_v7 }
 0x2f1   : > { %v2700_v29 = vsel %vm2517_vm0, %v2631_v39, %v2339_v42  ;;  %v2298_v44 = vpop.f32.mrf.mxu0 }
 0x2f2   : > { %2732 = vst [vmem:[%s4370_s21 + $0xb0] sm:$0xff] %v2700_v29  ;;  %v2693_v9 = vsel %vm2517_vm0, %v4400_v6, %v2304_v28  ;;  %v2299_v17 = vadd.f32 %v4363_v7, %v2298_v44  ;;  %v2666_v49 = vpop.permute.xlu1 %2665 }
 0x2f3   : > { %2725 = vst [vmem:[%s4370_s21 + $0x78] sm:$0xff] %v2693_v9 }
 0x2f4   : > { %v3117_v5 = vpop.f32.mrf.mxu1  ;;  %v2692_v22 = vsel %vm2517_vm0, %v4402_v59, %v2299_v17 }
 0x2f5   : > { %v2354_v48 = vadd.f32 %v3117_v5, %v4363_v7  ;;  %2724 = vst [vmem:[%s4370_s21 + $0x70] sm:$0xff] %v2692_v22 }
 0x2f6   : > { %v2348_v1 = vpop.f32.mrf.mxu1  ;;  %v2676_v38 = vpop.permute.xlu1 %2675 }
 0x2f7   : > { %v2703_v19 = vsel %vm2517_vm0, %v2646_v60, %v2354_v48  ;;  %v2349_v6 = vadd.f32 %v4363_v7, %v2348_v1 }
 0x2f8   : > { %2735 = vst [vmem:[%s4370_s21 + $0xc8] sm:$0xff] %v2703_v19 }
 0x2f9   : > { %v2702_v34 = vsel %vm2517_vm0, %v2641_v52, %v2349_v6 }
 0x2fa   : > { %2734 = vst [vmem:[%s4370_s21 + $0xc0] sm:$0xff] %v2702_v34 }
 0x2fc   : > { %v3120_v45 = vpop.f32.mrf.mxu1 }
 0x2fd   : > { %v2364_v59 = vadd.f32 %v3120_v45, %v4363_v7 }
 0x2fe   : > { %v2358_v16 = vpop.f32.mrf.mxu1 }
 0x2ff   : > { %v2705_v14 = vsel %vm2517_vm0, %v2656_v13, %v2364_v59  ;;  %v2359_v27 = vadd.f32 %v4363_v7, %v2358_v16 }
 0x300   : > { %2737 = vst [vmem:[%s4370_s21 + $0xd8] sm:$0xff] %v2705_v14 }
 0x301   : > { %v2704_v18 = vsel %vm2517_vm0, %v2651_v20, %v2359_v27 }
 0x302   : > { %2736 = vst [vmem:[%s4370_s21 + $0xd0] sm:$0xff] %v2704_v18 }
 0x304   : > { %v3123_v62 = vpop.f32.mrf.mxu1 }
 0x305   : > { %v2374_v55 = vadd.f32 %v3123_v62, %v4363_v7 }
 0x306   : > { %v2368_v33 = vpop.f32.mrf.mxu1 }
 0x307   : > { %v2707_v21 = vsel %vm2517_vm0, %v2666_v49, %v2374_v55  ;;  %v2369_v31 = vadd.f32 %v4363_v7, %v2368_v33 }
 0x308   : > { %2739 = vst [vmem:[%s4370_s21 + $0xe8] sm:$0xff] %v2707_v21 }
 0x309   : > { %v2706_v3 = vsel %vm2517_vm0, %v2661_v54, %v2369_v31 }
 0x30a   : > { %2738 = vst [vmem:[%s4370_s21 + $0xe0] sm:$0xff] %v2706_v3 }
 0x30c   : > { %v3126_v63 = vpop.f32.mrf.mxu1 }
 0x30d   : > { %v2384_v0 = vadd.f32 %v3126_v63, %v4363_v7 }
 0x30e   : > { %v2378_v25 = vpop.f32.mrf.mxu1 }
 0x30f   : > { %v2709_v32 = vsel %vm2517_vm0, %v2676_v38, %v2384_v0  ;;  %v2379_v43 = vadd.f32 %v4363_v7, %v2378_v25 }
 0x310   : > { %2741 = vst [vmem:[%s4370_s21 + $0xf8] sm:$0xff] %v2709_v32 }
 0x311   : > { %v2708_v10 = vsel %vm2517_vm0, %v2671_v12, %v2379_v43 }
 0x312   : > { %2740 = vst [vmem:[%s4370_s21 + $0xf0] sm:$0xff] %v2708_v10 }
 0x313   : > { %3431 = shalt.err (!%p3428_p5)
}
 0x314   : > { %s3432_s6 = scalar_lea.hbm %s4503_s19, 4096  ;;  %s3436_s21 = scalar_lea.hbm %s4566_s8, 8192 }
 0x315   : > { %p3433_p6 = scmp.ne.s32.totalorder %s4503_s19, %s3432_s6  ;;  %p3437_p10 = scmp.lt.s32.totalorder %s4503_s19, %s4566_s8 }
 0x316   : > { %p3438_p11 = scmp.lt.s32.totalorder %s3436_s21, %s3432_s6 }
 0x317   : > { %p3434_p7 = pnand %p3433_p6, %p3592_p4 }
 0x318   : > { %p3439_p12 = por %p3438_p11, %p3437_p10 }
 0x319   : > { %p3435_p9 = pneg %p3434_p7 }
 0x31b   : > { %p3440_p13 = pnand %p3439_p12, %p3435_p9 }
 0x31d   : > { %3443 = shalt.err (!%p3440_p13)
}
 0x31e   : > { %s3505_s22 = smov 128   ;;  %s3506_s24 = smov 8  }
 0x31f   : > { %3163 = dma.vmem_to_hbm [thread:$0]  (%p3592_p4), %s4505_s26, 4096, %s4503_s19, %s4513_s30, %s3505_s22, %s3505_s22, %s3506_s24  }
 0x320 PF: > { %p3175_p0 = scmp.ge.s32.totalorder %s3498_s10, 2  ;;  %s2771_s20 = sand.u32 1, %s3478_s27  }
 0x321   : > { %s2772_s11 = scalar_lea.sflag [#allocation5], %s2771_s20 }
 0x322   : > { %p3170_p1 = pnand %p3175_p0, %p3599_p8 }
 0x324   : > { %p3171_p2 = pneg %p3170_p1 }
 0x326   : > { %3473 = dma.done.wait (%p3171_p2), %s2772_s11, 4096  }
 0x327   : > { %3475 = vsyncadd (%p3171_p2), %s2772_s11, 4294963200  ;;  %s22_s10 = sadd.s32 1, %s3498_s10   ;;  %s4621_s27 = smov %s3482_s28 }
 0x328   : > { %p19_p3 = scmp.ge.s32.totalorder %s22_s10, 4   ;;  %s4622_s28 = smov %s3486_s29 }
 0x329   : > { %s4623_s29 = smov %s3605_s18  ;;  %s4624_s30 = smov %s3494_s9 }
 0x32a   : > { %s4625_s9 = smov %s4627_s13  ;;  %21 = sbr.rel (!%p19_p3) target bundleno = 7 (0x7), region = 115 }
 0x32f   :  { %2777 = vsyncpa [#allocation4], 1 }
 0x330   :  { %2779 = vsyncpa [#allocation4 + $0x1], 1 }
 0x331   :  { %2780 = vsyncpa [#allocation5], 1 }
 0x332   :  { %2782 = vsyncpa [#allocation5 + $0x1], 1 }

</bundles_post_ra>
